<compile_context>
chip_gen: v5e
topology: v5e:2x2
jax: 0.10.0
libtpu: 0.0.40
codegen_flags: <defaults>
</compile_context>

<pallas_src>
import jax
import jax.numpy as jnp
from jax.experimental import pallas as pl
from jax.experimental.pallas import tpu as pltpu  # noqa: F401  (TPU backend)

# ----------------------------- synthetic config ------------------------------
BATCH = 2
SEQ = 8
HIDDEN = 32
NUM_HEADS = 4
HEAD_DIM = HIDDEN // NUM_HEADS                  # 8
MEM_SLOTS = 16                                  # config.memory_slots
NUM_MEM_HEADS = 2                               # config.num_mem_heads
MEM_HEAD_SIZE = MEM_SLOTS // NUM_MEM_HEADS      # 8
MEM_TOTAL = NUM_MEM_HEADS * MEM_HEAD_SIZE       # 16

ATTN_SCALE = 1.0 / float(HEAD_DIM) ** 0.5
MEM_SCALE = 1.0 / float(MEM_HEAD_SIZE) ** 0.5
NEG_INF = -1e9

F32 = jnp.float32
BF16 = jnp.bfloat16

BS = BATCH * SEQ          # 16 packed token rows
BM = BATCH * MEM_SLOTS    # 32 packed memory-slot rows


# ------------------------------- fused kernel ---------------------------------
def _fused_kernel(x_ref, mem_ref, cosp_ref, sinp_ref,
                  wqkv_ref, wa_ref, wm_ref, whh_ref, wmh_ref, b_ref,
                  cm_attn_ref, cm_tok_ref, cm_slot_ref,
                  amask_ref, rmask_ref, umask_ref,
                  out_ref):
    H, NH = HIDDEN, NUM_HEADS
    MT, NMH = MEM_TOTAL, NUM_MEM_HEADS

    x = x_ref[...]                 # [BS, H]  f32
    mem = mem_ref[...]             # [BM, H]  f32
    cos_p = cosp_ref[...]          # [BS, H]  f32 (per-head tiled)
    sin_p = sinp_ref[...]          # [BS, H]  f32 (rotate_half sign folded in)
    b = b_ref[...]                 # [2, H]   f32
    bg, bz = b[0:1, :], b[1:2, :]
    wo, wgr, wzc = whh_ref[0], whh_ref[1], whh_ref[2]     # bf16 [H, H]
    wor, wou = wmh_ref[0], wmh_ref[1]                     # bf16 [MT, H]
    cm_attn = cm_attn_ref[...]     # [NH*BS, H]   head-lane mask (f32 0/1)
    cm_tok = cm_tok_ref[...]       # [NMH*BS, MT]
    cm_slot = cm_slot_ref[...]     # [NMH*BM, MT]

    def mm(a, w):                  # [m,k]@[k,n] with f32 accumulation
        return jnp.dot(a, w, preferred_element_type=F32)

    def mm_nt(a, c):               # a @ c^T with f32 accumulation
        return jax.lax.dot_general(a, c, (((1,), (1,)), ((), ())),
                                   preferred_element_type=F32)

    def softmax_rows(s):           # numerically stable, EUP reciprocal
        s = s - jnp.max(s, axis=-1, keepdims=True)
        p = jnp.exp(s)
        return p * pl.reciprocal(jnp.sum(p, axis=-1, keepdims=True), approx=True)

    def rowtile(t, n):             # repeat along sublanes (cheap vreg copies)
        return jnp.concatenate([t] * n, axis=0)

    # ---------------- self-attention (Llama-style, RoPE) ----------------
    proj = mm(x.astype(BF16), wqkv_ref[...])              # [BS, 5H] f32
    q = proj[:, 0 * H:1 * H]        # ATTN_SCALE pre-folded
    q_rot = proj[:, 1 * H:2 * H]    # x @ (wq with per-head half-swapped cols)
    k = proj[:, 2 * H:3 * H]
    k_rot = proj[:, 3 * H:4 * H]
    v = proj[:, 4 * H:5 * H]
    q_r = q * cos_p + q_rot * sin_p                        # RoPE, packed layout
    k_r = k * cos_p + k_rot * sin_p

    q_bd = (rowtile(q_r, NH) * cm_attn).astype(BF16)       # [NH*BS, H]
    k_bd = rowtile(k_r, NH).astype(BF16)                   # [NH*BS, H]
    v_bd = (rowtile(v, NH) * cm_attn).astype(BF16)         # [NH*BS, H]
    s_att = mm_nt(q_bd, k_bd) + amask_ref[...]             # [NH*BS, NH*BS]
    p_att = softmax_rows(s_att).astype(BF16)
    ctx_bd = mm(p_att, v_bd)                               # [NH*BS, H]
    ctx = jnp.sum(ctx_bd.reshape(NH, BS, H), axis=0)       # packed [BS, H]
    attn = mm(ctx.astype(BF16), wo)                        # [BS, H]

    # ---------------- memory module: fused activation projections ----------------
    a_proj = mm(attn.astype(BF16), wa_ref[...])            # [BS, 3MT+H]
    m_proj = mm(mem.astype(BF16), wm_ref[...])             # [BM, 3MT+H]
    qm = a_proj[:, 0 * MT:1 * MT]      # read query    (MEM_SCALE folded)
    ku = a_proj[:, 1 * MT:2 * MT]      # update key
    vu = a_proj[:, 2 * MT:3 * MT]      # update value
    gx = a_proj[:, 3 * MT:]            # gate term
    km = m_proj[:, 0 * MT:1 * MT]      # read key
    vm = m_proj[:, 1 * MT:2 * MT]      # read value
    qu = m_proj[:, 2 * MT:3 * MT]      # update query  (MEM_SCALE folded)
    zm = m_proj[:, 3 * MT:]            # z-gate term

    # -- memory read: tokens attend over memory slots --
    qm_bd = (rowtile(qm, NMH) * cm_tok).astype(BF16)       # [NMH*BS, MT]
    km_bd = rowtile(km, NMH).astype(BF16)                  # [NMH*BM, MT]
    vm_bd = (rowtile(vm, NMH) * cm_slot).astype(BF16)      # [NMH*BM, MT]
    s_r = mm_nt(qm_bd, km_bd) + rmask_ref[...]             # [NMH*BS, NMH*BM]
    p_r = softmax_rows(s_r).astype(BF16)
    read_bd = mm(p_r, vm_bd)                               # [NMH*BS, MT]
    read = jnp.sum(read_bd.reshape(NMH, BS, MT), axis=0)   # packed [BS, MT]
    mem_read = mm(read.astype(BF16), wor)                  # [BS, H]

    # -- gated combination --
    g = jax.nn.sigmoid(gx + mm(mem_read.astype(BF16), wgr) + bg)
    gated = g * attn + (1.0 - g) * mem_read                # [BS, H]

    # -- memory update: slots attend over (key-masked) tokens --
    qu_bd = (rowtile(qu, NMH) * cm_slot).astype(BF16)      # [NMH*BM, MT]
    ku_bd = rowtile(ku, NMH).astype(BF16)                  # [NMH*BS, MT]
    vu_bd = (rowtile(vu, NMH) * cm_tok).astype(BF16)       # [NMH*BS, MT]
    s_u = mm_nt(qu_bd, ku_bd) + umask_ref[...]             # [NMH*BM, NMH*BS]
    p_u = softmax_rows(s_u).astype(BF16)
    upd_bd = mm(p_u, vu_bd)                                # [NMH*BM, MT]
    upd = jnp.sum(upd_bd.reshape(NMH, BM, MT), axis=0)     # packed [BM, MT]
    cand = mm(upd.astype(BF16), wou)                       # [BM, H]
    z = jax.nn.sigmoid(zm + mm(cand.astype(BF16), wzc) + bz)
    new_mem = (1.0 - z) * mem + z * jnp.tanh(cand)         # [BM, H]

    out_ref[...] = jnp.concatenate([gated, new_mem], axis=0)   # [BS+BM, H]


# --------------------- one-time host-side operand preparation -------------------
def prepare_constants(params, cos, sin):
    """One-time fusion of weights, RoPE tables and head-block lane masks."""
    D, NH, H = HEAD_DIM, NUM_HEADS, HIDDEN

    # per-head half-swap permutation of the H projection columns (rotate_half
    # without the sign; the sign is folded into the sin table below)
    swap = jnp.concatenate([jnp.arange(D // 2, D), jnp.arange(0, D // 2)])
    perm = jnp.concatenate([h * D + swap for h in range(NH)])

    wq_s = params["wq"] * ATTN_SCALE                       # fold attention scale
    w_qkv = jnp.concatenate(
        [wq_s, wq_s[:, perm], params["wk"], params["wk"][:, perm], params["wv"]],
        axis=1)                                            # [H, 5H]
    w_a = jnp.concatenate(
        [params["wqr"] * MEM_SCALE, params["wku"], params["wvu"], params["wgx"]],
        axis=1)                                            # [H, 3*MT+H]
    w_m = jnp.concatenate(
        [params["wkr"], params["wvr"], params["wqu"] * MEM_SCALE, params["wzm"]],
        axis=1)                                            # [H, 3*MT+H]
    w_hh = jnp.stack([params["wo"], params["wgr"], params["wzc"]], axis=0)
    w_mh = jnp.stack([params["wor"], params["wou"]], axis=0)
    biases = jnp.concatenate([params["bg"], params["bz"]], axis=0)           # [2, H]

    # RoPE tables tiled per head and per batch to the packed [B*S, H] layout,
    # with the rotate_half sign folded into sin.
    sign = jnp.concatenate([-jnp.ones((D // 2,), F32), jnp.ones((D // 2,), F32)])
    cos_p = jnp.tile(jnp.tile(cos, (1, NH)), (BATCH, 1))
    sin_p = jnp.tile(jnp.tile(sin * sign[None, :], (1, NH)), (BATCH, 1))

    # head-block lane masks (1 where a lane belongs to the row-block's head)
    cm_attn = jnp.kron(jnp.eye(NH, dtype=F32), jnp.ones((BS, D), F32))
    cm_tok = jnp.kron(jnp.eye(NUM_MEM_HEADS, dtype=F32),
                      jnp.ones((BS, MEM_HEAD_SIZE), F32))
    cm_slot = jnp.kron(jnp.eye(NUM_MEM_HEADS, dtype=F32),
                       jnp.ones((BM, MEM_HEAD_SIZE), F32))

    return {
        "w_qkv": w_qkv.astype(BF16), "w_a": w_a.astype(BF16),
        "w_m": w_m.astype(BF16), "w_hh": w_hh.astype(BF16),
        "w_mh": w_mh.astype(BF16), "biases": biases,
        "cos_p": cos_p, "sin_p": sin_p,
        "cm_attn": cm_attn, "cm_tok": cm_tok, "cm_slot": cm_slot,
    }


def prepare_masks(attention_mask):
    """Additive block-diagonal score masks for the batch-folded, head-packed
    score matrices (same head AND same batch AND the module's causal/key mask)."""
    B, S, M = BATCH, SEQ, MEM_SLOTS
    NH, NMH = NUM_HEADS, NUM_MEM_HEADS
    mask2d = attention_mask[:, 0]                     # [B, S, S] additive
    key_mask = mask2d[:, S - 1, :]                    # [B, S]

    eye_b = jnp.eye(B, dtype=F32)
    same_a = (jnp.eye(NH, dtype=F32)[:, None, None, :, None, None]
              * eye_b[None, :, None, None, :, None])          # [NH,B,1,NH,B,1]
    amask = jnp.where(same_a > 0, mask2d[None, :, :, None, None, :], NEG_INF)
    amask = jnp.broadcast_to(amask, (NH, B, S, NH, B, S))
    amask = amask.reshape(NH * B * S, NH * B * S)

    same_m = (jnp.eye(NMH, dtype=F32)[:, None, None, :, None, None]
              * eye_b[None, :, None, None, :, None])          # [NMH,B,1,NMH,B,1]
    rmask = jnp.where(same_m > 0, 0.0, NEG_INF)
    rmask = jnp.broadcast_to(rmask, (NMH, B, S, NMH, B, M))
    rmask = rmask.reshape(NMH * B * S, NMH * B * M)

    umask = jnp.where(same_m > 0, key_mask[None, :, None, None, None, :], NEG_INF)
    umask = jnp.broadcast_to(umask, (NMH, B, M, NMH, B, S))
    umask = umask.reshape(NMH * B * M, NMH * B * S)

    return {"amask": amask, "rmask": rmask, "umask": umask}


# ------------------------------- wrapper ----------------------------------------
def memory_attention_pallas(hidden_states, memory, consts, masks):
    B, S, H = hidden_states.shape
    M = memory.shape[1]
    x2 = hidden_states.reshape(B * S, H)
    m2 = memory.reshape(B * M, H)

    out = pl.pallas_call(
        _fused_kernel,
        out_shape=jax.ShapeDtypeStruct((B * S + B * M, H), F32),
        cost_estimate=pl.CostEstimate(
            flops=1_500_000, transcendentals=16_000, bytes_accessed=100_000),
    )(x2, m2, consts["cos_p"], consts["sin_p"],
      consts["w_qkv"], consts["w_a"], consts["w_m"],
      consts["w_hh"], consts["w_mh"], consts["biases"],
      consts["cm_attn"], consts["cm_tok"], consts["cm_slot"],
      masks["amask"], masks["rmask"], masks["umask"])

    gated = out[:B * S].reshape(B, S, H)
    new_mem = out[B * S:].reshape(B, M, H)
    return gated, new_mem


# ------------------------------- pure-JAX reference -----------------------------
def _rotate_half(x):
    h = x.shape[-1] // 2
    return jnp.concatenate([-x[..., h:], x[..., :h]], axis=-1)


def _softmax_last(s):
    s = s - jnp.max(s, axis=-1, keepdims=True)
    p = jnp.exp(s)
    return p / jnp.sum(p, axis=-1, keepdims=True)


def _self_attn_math(x, cos, sin, mask2d, wq, wk, wv, wo):
    q = jnp.dot(x, wq)
    k = jnp.dot(x, wk)
    v = jnp.dot(x, wv)
    heads = []
    for h in range(NUM_HEADS):
        sl = slice(h * HEAD_DIM, (h + 1) * HEAD_DIM)
        qh, kh, vh = q[:, sl], k[:, sl], v[:, sl]
        qh = qh * cos + _rotate_half(qh) * sin
        kh = kh * cos + _rotate_half(kh) * sin
        scores = jnp.dot(qh, kh.T) * ATTN_SCALE + mask2d
        heads.append(jnp.dot(_softmax_last(scores), vh))
    return jnp.dot(jnp.concatenate(heads, axis=-1), wo)


def _memory_math(a, mem, mask2d,
                 wqr, wkr, wvr, wor, wgx, wgr, bg,
                 wqu, wku, wvu, wou, wzm, wzc, bz):
    key_mask = mask2d[SEQ - 1:SEQ, :]
    qm, km, vm = jnp.dot(a, wqr), jnp.dot(mem, wkr), jnp.dot(mem, wvr)
    read_heads = []
    for h in range(NUM_MEM_HEADS):
        sl = slice(h * MEM_HEAD_SIZE, (h + 1) * MEM_HEAD_SIZE)
        s = jnp.dot(qm[:, sl], km[:, sl].T) * MEM_SCALE
        read_heads.append(jnp.dot(_softmax_last(s), vm[:, sl]))
    mem_read = jnp.dot(jnp.concatenate(read_heads, axis=-1), wor)
    g = jax.nn.sigmoid(jnp.dot(a, wgx) + jnp.dot(mem_read, wgr) + bg)
    gated = g * a + (1.0 - g) * mem_read
    qu, ku, vu = jnp.dot(mem, wqu), jnp.dot(a, wku), jnp.dot(a, wvu)
    upd_heads = []
    for h in range(NUM_MEM_HEADS):
        sl = slice(h * MEM_HEAD_SIZE, (h + 1) * MEM_HEAD_SIZE)
        s = jnp.dot(qu[:, sl], ku[:, sl].T) * MEM_SCALE + key_mask
        upd_heads.append(jnp.dot(_softmax_last(s), vu[:, sl]))
    cand = jnp.dot(jnp.concatenate(upd_heads, axis=-1), wou)
    z = jax.nn.sigmoid(jnp.dot(mem, wzm) + jnp.dot(cand, wzc) + bz)
    new_mem = (1.0 - z) * mem + z * jnp.tanh(cand)
    return gated, new_mem


def memory_attention_reference(hidden_states, memory, attention_mask, cos, sin, p):
    mask2d = attention_mask[:, 0]
    attn = jax.vmap(_self_attn_math,
                    in_axes=(0, None, None, 0, None, None, None, None))(
        hidden_states, cos, sin, mask2d, p["wq"], p["wk"], p["wv"], p["wo"])
    gated, new_mem = jax.vmap(_memory_math, in_axes=(0, 0, 0) + (None,) * 14)(
        attn, memory, mask2d,
        p["wqr"], p["wkr"], p["wvr"], p["wor"],
        p["wgx"], p["wgr"], p["bg"],
        p["wqu"], p["wku"], p["wvu"], p["wou"],
        p["wzm"], p["wzc"], p["bz"])
    return gated, new_mem


# ------------------------------- init / main ------------------------------------
def init_params(key):
    shapes = {
        "wq": (HIDDEN, HIDDEN), "wk": (HIDDEN, HIDDEN),
        "wv": (HIDDEN, HIDDEN), "wo": (HIDDEN, HIDDEN),
        "wqr": (HIDDEN, MEM_TOTAL), "wkr": (HIDDEN, MEM_TOTAL),
        "wvr": (HIDDEN, MEM_TOTAL), "wor": (MEM_TOTAL, HIDDEN),
        "wgx": (HIDDEN, HIDDEN), "wgr": (HIDDEN, HIDDEN), "bg": (1, HIDDEN),
        "wqu": (HIDDEN, MEM_TOTAL), "wku": (HIDDEN, MEM_TOTAL),
        "wvu": (HIDDEN, MEM_TOTAL), "wou": (MEM_TOTAL, HIDDEN),
        "wzm": (HIDDEN, HIDDEN), "wzc": (HIDDEN, HIDDEN), "bz": (1, HIDDEN),
    }
    params = {}
    for i, (name, shape) in enumerate(sorted(shapes.items())):
        params[name] = 0.05 * jax.random.normal(jax.random.fold_in(key, i),
                                                shape, F32)
    return params


if __name__ == "__main__":
    key = jax.random.PRNGKey(0)
    k_x, k_m, k_p = jax.random.split(key, 3)

    hidden_states = jax.random.normal(k_x, (BATCH, SEQ, HIDDEN), F32)
    memory = jax.random.normal(k_m, (BATCH, MEM_SLOTS, HIDDEN), F32)
    params = init_params(k_p)

    # rotary position embeddings (position_ids = arange(SEQ))
    pos = jnp.arange(SEQ, dtype=F32)
    inv_freq = 1.0 / (10000.0 ** (jnp.arange(0, HEAD_DIM, 2, dtype=F32) / HEAD_DIM))
    freqs = jnp.outer(pos, inv_freq)
    emb = jnp.concatenate([freqs, freqs], axis=-1)
    cos, sin = jnp.cos(emb), jnp.sin(emb)            # [S, HEAD_DIM]

    # additive causal attention mask [B, 1, S, S]
    causal = jnp.tril(jnp.ones((SEQ, SEQ), dtype=bool))
    attention_mask = jnp.where(causal, 0.0, NEG_INF).astype(F32)
    attention_mask = jnp.broadcast_to(attention_mask, (BATCH, 1, SEQ, SEQ))

    # one-time host-side operand fusion (hoisted out of the forward path)
    consts = jax.tree_util.tree_map(jax.block_until_ready,
                                    prepare_constants(params, cos, sin))
    masks = jax.tree_util.tree_map(jax.block_until_ready,
                                   prepare_masks(attention_mask))

    gated_memory, updated_memory = memory_attention_pallas(
        hidden_states, memory, consts, masks)
    jax.block_until_ready((gated_memory, updated_memory))

    ref_gated, ref_updated = memory_attention_reference(
        hidden_states, memory, attention_mask, cos, sin, params)
    jax.block_until_ready((ref_gated, ref_updated))

    assert gated_memory.shape == (BATCH, SEQ, HIDDEN)
    assert updated_memory.shape == (BATCH, MEM_SLOTS, HIDDEN)
    assert bool(jnp.allclose(gated_memory, ref_gated, atol=5e-2, rtol=5e-2))
    assert bool(jnp.allclose(updated_memory, ref_updated, atol=5e-2, rtol=5e-2))

    print("KERNEL_OK")
</pallas_src>

<mosaic_0001>
module attributes {stable_mosaic.version = 11 : i64} {
  func.func @_fused_kernel(%arg0: memref<16x32xf32, #tpu.memory_space<vmem>>, %arg1: memref<32x32xf32, #tpu.memory_space<vmem>>, %arg2: memref<16x32xf32, #tpu.memory_space<vmem>>, %arg3: memref<16x32xf32, #tpu.memory_space<vmem>>, %arg4: memref<32x160xbf16, #tpu.memory_space<vmem>>, %arg5: memref<32x80xbf16, #tpu.memory_space<vmem>>, %arg6: memref<32x80xbf16, #tpu.memory_space<vmem>>, %arg7: memref<3x32x32xbf16, #tpu.memory_space<vmem>>, %arg8: memref<2x16x32xbf16, #tpu.memory_space<vmem>>, %arg9: memref<2x32xf32, #tpu.memory_space<vmem>>, %arg10: memref<64x32xf32, #tpu.memory_space<vmem>>, %arg11: memref<32x16xf32, #tpu.memory_space<vmem>>, %arg12: memref<64x16xf32, #tpu.memory_space<vmem>>, %arg13: memref<64x64xf32, #tpu.memory_space<vmem>>, %arg14: memref<32x64xf32, #tpu.memory_space<vmem>>, %arg15: memref<64x32xf32, #tpu.memory_space<vmem>>, %arg16: memref<48x32xf32, #tpu.memory_space<vmem>>) attributes {dimension_semantics = [], scalar_prefetch = 0 : i64, scratch_operands = 0 : i64, tpu.core_type = #tpu.core_type<tc>} {
    %c0 = arith.constant 0 : index
    %c0_0 = arith.constant 0 : index
    %0 = vector.load %arg0[%c0, %c0_0] : memref<16x32xf32, #tpu.memory_space<vmem>>, vector<16x32xf32>
    %c0_1 = arith.constant 0 : index
    %c0_2 = arith.constant 0 : index
    %1 = vector.load %arg1[%c0_1, %c0_2] : memref<32x32xf32, #tpu.memory_space<vmem>>, vector<32x32xf32>
    %c0_3 = arith.constant 0 : index
    %c0_4 = arith.constant 0 : index
    %2 = vector.load %arg2[%c0_3, %c0_4] : memref<16x32xf32, #tpu.memory_space<vmem>>, vector<16x32xf32>
    %c0_5 = arith.constant 0 : index
    %c0_6 = arith.constant 0 : index
    %3 = vector.load %arg3[%c0_5, %c0_6] : memref<16x32xf32, #tpu.memory_space<vmem>>, vector<16x32xf32>
    %c0_7 = arith.constant 0 : index
    %c0_8 = arith.constant 0 : index
    %4 = vector.load %arg9[%c0_7, %c0_8] : memref<2x32xf32, #tpu.memory_space<vmem>>, vector<2x32xf32>
    %5 = vector.extract_strided_slice %4 {offsets = [0, 0], sizes = [1, 32], strides = [1, 1]} : vector<2x32xf32> to vector<1x32xf32>
    %6 = vector.extract_strided_slice %4 {offsets = [1, 0], sizes = [1, 32], strides = [1, 1]} : vector<2x32xf32> to vector<1x32xf32>
    %c0_9 = arith.constant 0 : index
    %c0_10 = arith.constant 0 : index
    %c0_11 = arith.constant 0 : index
    %7 = vector.load %arg7[%c0_9, %c0_10, %c0_11] : memref<3x32x32xbf16, #tpu.memory_space<vmem>>, vector<1x32x32xbf16>
    %8 = vector.shape_cast %7 : vector<1x32x32xbf16> to vector<32x32xbf16>
    %c1 = arith.constant 1 : index
    %c0_12 = arith.constant 0 : index
    %c0_13 = arith.constant 0 : index
    %9 = vector.load %arg7[%c1, %c0_12, %c0_13] : memref<3x32x32xbf16, #tpu.memory_space<vmem>>, vector<1x32x32xbf16>
    %10 = vector.shape_cast %9 : vector<1x32x32xbf16> to vector<32x32xbf16>
    %c2 = arith.constant 2 : index
    %c0_14 = arith.constant 0 : index
    %c0_15 = arith.constant 0 : index
    %11 = vector.load %arg7[%c2, %c0_14, %c0_15] : memref<3x32x32xbf16, #tpu.memory_space<vmem>>, vector<1x32x32xbf16>
    %12 = vector.shape_cast %11 : vector<1x32x32xbf16> to vector<32x32xbf16>
    %c0_16 = arith.constant 0 : index
    %c0_17 = arith.constant 0 : index
    %c0_18 = arith.constant 0 : index
    %13 = vector.load %arg8[%c0_16, %c0_17, %c0_18] : memref<2x16x32xbf16, #tpu.memory_space<vmem>>, vector<1x16x32xbf16>
    %14 = vector.shape_cast %13 : vector<1x16x32xbf16> to vector<16x32xbf16>
    %c1_19 = arith.constant 1 : index
    %c0_20 = arith.constant 0 : index
    %c0_21 = arith.constant 0 : index
    %15 = vector.load %arg8[%c1_19, %c0_20, %c0_21] : memref<2x16x32xbf16, #tpu.memory_space<vmem>>, vector<1x16x32xbf16>
    %16 = vector.shape_cast %15 : vector<1x16x32xbf16> to vector<16x32xbf16>
    %c0_22 = arith.constant 0 : index
    %c0_23 = arith.constant 0 : index
    %17 = vector.load %arg10[%c0_22, %c0_23] : memref<64x32xf32, #tpu.memory_space<vmem>>, vector<64x32xf32>
    %c0_24 = arith.constant 0 : index
    %c0_25 = arith.constant 0 : index
    %18 = vector.load %arg11[%c0_24, %c0_25] : memref<32x16xf32, #tpu.memory_space<vmem>>, vector<32x16xf32>
    %c0_26 = arith.constant 0 : index
    %c0_27 = arith.constant 0 : index
    %19 = vector.load %arg12[%c0_26, %c0_27] : memref<64x16xf32, #tpu.memory_space<vmem>>, vector<64x16xf32>
    %20 = arith.truncf %0 : vector<16x32xf32> to vector<16x32xbf16>
    %c0_28 = arith.constant 0 : index
    %c0_29 = arith.constant 0 : index
    %21 = vector.load %arg4[%c0_28, %c0_29] : memref<32x160xbf16, #tpu.memory_space<vmem>>, vector<32x160xbf16>
    %cst = arith.constant dense<0.000000e+00> : vector<16x160xf32>
    %22 = tpu.matmul %20, %21, %cst {dimension_numbers = #tpu.dot_dimension_numbers<[1], [0], [0], [1], [0, 0, 1, 1], [], []>} : vector<16x32xbf16>, vector<32x160xbf16>, vector<16x160xf32> -> vector<16x160xf32>
    %23 = vector.extract_strided_slice %22 {offsets = [0, 0], sizes = [16, 32], strides = [1, 1]} : vector<16x160xf32> to vector<16x32xf32>
    %24 = vector.extract_strided_slice %22 {offsets = [0, 32], sizes = [16, 32], strides = [1, 1]} : vector<16x160xf32> to vector<16x32xf32>
    %25 = vector.extract_strided_slice %22 {offsets = [0, 64], sizes = [16, 32], strides = [1, 1]} : vector<16x160xf32> to vector<16x32xf32>
    %26 = vector.extract_strided_slice %22 {offsets = [0, 96], sizes = [16, 32], strides = [1, 1]} : vector<16x160xf32> to vector<16x32xf32>
    %27 = vector.extract_strided_slice %22 {offsets = [0, 128], sizes = [16, 32], strides = [1, 1]} : vector<16x160xf32> to vector<16x32xf32>
    %28 = arith.mulf %23, %2 : vector<16x32xf32>
    %29 = arith.mulf %24, %3 : vector<16x32xf32>
    %30 = arith.addf %28, %29 : vector<16x32xf32>
    %31 = arith.mulf %25, %2 : vector<16x32xf32>
    %32 = arith.mulf %26, %3 : vector<16x32xf32>
    %33 = arith.addf %31, %32 : vector<16x32xf32>
    %34 = tpu.concatenate %30, %30, %30, %30 in 0 : vector<16x32xf32>, vector<16x32xf32>, vector<16x32xf32>, vector<16x32xf32> -> vector<64x32xf32>
    %35 = arith.mulf %34, %17 : vector<64x32xf32>
    %36 = arith.truncf %35 : vector<64x32xf32> to vector<64x32xbf16>
    %37 = tpu.concatenate %33, %33, %33, %33 in 0 : vector<16x32xf32>, vector<16x32xf32>, vector<16x32xf32>, vector<16x32xf32> -> vector<64x32xf32>
    %38 = arith.truncf %37 : vector<64x32xf32> to vector<64x32xbf16>
    %39 = tpu.concatenate %27, %27, %27, %27 in 0 : vector<16x32xf32>, vector<16x32xf32>, vector<16x32xf32>, vector<16x32xf32> -> vector<64x32xf32>
    %40 = arith.mulf %39, %17 : vector<64x32xf32>
    %41 = arith.truncf %40 : vector<64x32xf32> to vector<64x32xbf16>
    %cst_30 = arith.constant dense<0.000000e+00> : vector<64x64xf32>
    %42 = tpu.matmul %36, %38, %cst_30 {dimension_numbers = #tpu.dot_dimension_numbers<[1], [1], [0], [0], [0, 0, 1, 0], [], []>} : vector<64x32xbf16>, vector<64x32xbf16>, vector<64x64xf32> -> vector<64x64xf32>
    %c0_31 = arith.constant 0 : index
    %c0_32 = arith.constant 0 : index
    %43 = vector.load %arg13[%c0_31, %c0_32] : memref<64x64xf32, #tpu.memory_space<vmem>>, vector<64x64xf32>
    %44 = arith.addf %42, %43 : vector<64x64xf32>
    %cst_33 = arith.constant dense<0xFF800000> : vector<64xf32>
    %45 = vector.multi_reduction <maximumf>, %44, %cst_33 [1] : vector<64x64xf32> to vector<64xf32>
    %46 = vector.shape_cast %45 : vector<64xf32> to vector<64x1xf32>
    %47 = vector.broadcast %46 : vector<64x1xf32> to vector<64x64xf32>
    %48 = arith.subf %44, %47 : vector<64x64xf32>
    %49 = math.exp %48 : vector<64x64xf32>
    %cst_34 = arith.constant dense<0.000000e+00> : vector<64xf32>
    %50 = vector.multi_reduction <add>, %49, %cst_34 [1] : vector<64x64xf32> to vector<64xf32>
    %51 = vector.shape_cast %50 : vector<64xf32> to vector<64x1xf32>
    %52 = tpu.reciprocal %51 {approx = true} : vector<64x1xf32> -> vector<64x1xf32>
    %53 = vector.broadcast %52 : vector<64x1xf32> to vector<64x64xf32>
    %54 = arith.mulf %49, %53 : vector<64x64xf32>
    %55 = arith.truncf %54 : vector<64x64xf32> to vector<64x64xbf16>
    %cst_35 = arith.constant dense<0.000000e+00> : vector<64x32xf32>
    %56 = tpu.matmul %55, %41, %cst_35 {dimension_numbers = #tpu.dot_dimension_numbers<[1], [0], [0], [1], [0, 0, 1, 1], [], []>} : vector<64x64xbf16>, vector<64x32xbf16>, vector<64x32xf32> -> vector<64x32xf32>
    %57 = vector.shape_cast %56 : vector<64x32xf32> to vector<4x16x32xf32>
    %cst_36 = arith.constant dense<0.000000e+00> : vector<16x32xf32>
    %58 = vector.multi_reduction <add>, %57, %cst_36 [0] : vector<4x16x32xf32> to vector<16x32xf32>
    %59 = arith.truncf %58 : vector<16x32xf32> to vector<16x32xbf16>
    %cst_37 = arith.constant dense<0.000000e+00> : vector<16x32xf32>
    %60 = tpu.matmul %59, %8, %cst_37 {dimension_numbers = #tpu.dot_dimension_numbers<[1], [0], [0], [1], [0, 0, 1, 1], [], []>} : vector<16x32xbf16>, vector<32x32xbf16>, vector<16x32xf32> -> vector<16x32xf32>
    %61 = arith.truncf %60 : vector<16x32xf32> to vector<16x32xbf16>
    %c0_38 = arith.constant 0 : index
    %c0_39 = arith.constant 0 : index
    %62 = vector.load %arg5[%c0_38, %c0_39] : memref<32x80xbf16, #tpu.memory_space<vmem>>, vector<32x80xbf16>
    %cst_40 = arith.constant dense<0.000000e+00> : vector<16x80xf32>
    %63 = tpu.matmul %61, %62, %cst_40 {dimension_numbers = #tpu.dot_dimension_numbers<[1], [0], [0], [1], [0, 0, 1, 1], [], []>} : vector<16x32xbf16>, vector<32x80xbf16>, vector<16x80xf32> -> vector<16x80xf32>
    %64 = arith.truncf %1 : vector<32x32xf32> to vector<32x32xbf16>
    %c0_41 = arith.constant 0 : index
    %c0_42 = arith.constant 0 : index
    %65 = vector.load %arg6[%c0_41, %c0_42] : memref<32x80xbf16, #tpu.memory_space<vmem>>, vector<32x80xbf16>
    %cst_43 = arith.constant dense<0.000000e+00> : vector<32x80xf32>
    %66 = tpu.matmul %64, %65, %cst_43 {dimension_numbers = #tpu.dot_dimension_numbers<[1], [0], [0], [1], [0, 0, 1, 1], [], []>} : vector<32x32xbf16>, vector<32x80xbf16>, vector<32x80xf32> -> vector<32x80xf32>
    %67 = vector.extract_strided_slice %63 {offsets = [0, 0], sizes = [16, 16], strides = [1, 1]} : vector<16x80xf32> to vector<16x16xf32>
    %68 = vector.extract_strided_slice %63 {offsets = [0, 16], sizes = [16, 16], strides = [1, 1]} : vector<16x80xf32> to vector<16x16xf32>
    %69 = vector.extract_strided_slice %63 {offsets = [0, 32], sizes = [16, 16], strides = [1, 1]} : vector<16x80xf32> to vector<16x16xf32>
    %70 = vector.extract_strided_slice %63 {offsets = [0, 48], sizes = [16, 32], strides = [1, 1]} : vector<16x80xf32> to vector<16x32xf32>
    %71 = vector.extract_strided_slice %66 {offsets = [0, 0], sizes = [32, 16], strides = [1, 1]} : vector<32x80xf32> to vector<32x16xf32>
    %72 = vector.extract_strided_slice %66 {offsets = [0, 16], sizes = [32, 16], strides = [1, 1]} : vector<32x80xf32> to vector<32x16xf32>
    %73 = vector.extract_strided_slice %66 {offsets = [0, 32], sizes = [32, 16], strides = [1, 1]} : vector<32x80xf32> to vector<32x16xf32>
    %74 = vector.extract_strided_slice %66 {offsets = [0, 48], sizes = [32, 32], strides = [1, 1]} : vector<32x80xf32> to vector<32x32xf32>
    %75 = tpu.concatenate %67, %67 in 0 : vector<16x16xf32>, vector<16x16xf32> -> vector<32x16xf32>
    %76 = arith.mulf %75, %18 : vector<32x16xf32>
    %77 = arith.truncf %76 : vector<32x16xf32> to vector<32x16xbf16>
    %78 = tpu.concatenate %71, %71 in 0 : vector<32x16xf32>, vector<32x16xf32> -> vector<64x16xf32>
    %79 = arith.truncf %78 : vector<64x16xf32> to vector<64x16xbf16>
    %80 = tpu.concatenate %72, %72 in 0 : vector<32x16xf32>, vector<32x16xf32> -> vector<64x16xf32>
    %81 = arith.mulf %80, %19 : vector<64x16xf32>
    %82 = arith.truncf %81 : vector<64x16xf32> to vector<64x16xbf16>
    %cst_44 = arith.constant dense<0.000000e+00> : vector<32x64xf32>
    %83 = tpu.matmul %77, %79, %cst_44 {dimension_numbers = #tpu.dot_dimension_numbers<[1], [1], [0], [0], [0, 0, 1, 0], [], []>} : vector<32x16xbf16>, vector<64x16xbf16>, vector<32x64xf32> -> vector<32x64xf32>
    %c0_45 = arith.constant 0 : index
    %c0_46 = arith.constant 0 : index
    %84 = vector.load %arg14[%c0_45, %c0_46] : memref<32x64xf32, #tpu.memory_space<vmem>>, vector<32x64xf32>
    %85 = arith.addf %83, %84 : vector<32x64xf32>
    %cst_47 = arith.constant dense<0xFF800000> : vector<32xf32>
    %86 = vector.multi_reduction <maximumf>, %85, %cst_47 [1] : vector<32x64xf32> to vector<32xf32>
    %87 = vector.shape_cast %86 : vector<32xf32> to vector<32x1xf32>
    %88 = vector.broadcast %87 : vector<32x1xf32> to vector<32x64xf32>
    %89 = arith.subf %85, %88 : vector<32x64xf32>
    %90 = math.exp %89 : vector<32x64xf32>
    %cst_48 = arith.constant dense<0.000000e+00> : vector<32xf32>
    %91 = vector.multi_reduction <add>, %90, %cst_48 [1] : vector<32x64xf32> to vector<32xf32>
    %92 = vector.shape_cast %91 : vector<32xf32> to vector<32x1xf32>
    %93 = tpu.reciprocal %92 {approx = true} : vector<32x1xf32> -> vector<32x1xf32>
    %94 = vector.broadcast %93 : vector<32x1xf32> to vector<32x64xf32>
    %95 = arith.mulf %90, %94 : vector<32x64xf32>
    %96 = arith.truncf %95 : vector<32x64xf32> to vector<32x64xbf16>
    %cst_49 = arith.constant dense<0.000000e+00> : vector<32x16xf32>
    %97 = tpu.matmul %96, %82, %cst_49 {dimension_numbers = #tpu.dot_dimension_numbers<[1], [0], [0], [1], [0, 0, 1, 1], [], []>} : vector<32x64xbf16>, vector<64x16xbf16>, vector<32x16xf32> -> vector<32x16xf32>
    %98 = vector.shape_cast %97 : vector<32x16xf32> to vector<2x16x16xf32>
    %cst_50 = arith.constant dense<0.000000e+00> : vector<16x16xf32>
    %99 = vector.multi_reduction <add>, %98, %cst_50 [0] : vector<2x16x16xf32> to vector<16x16xf32>
    %100 = arith.truncf %99 : vector<16x16xf32> to vector<16x16xbf16>
    %cst_51 = arith.constant dense<0.000000e+00> : vector<16x32xf32>
    %101 = tpu.matmul %100, %14, %cst_51 {dimension_numbers = #tpu.dot_dimension_numbers<[1], [0], [0], [1], [0, 0, 1, 1], [], []>} : vector<16x16xbf16>, vector<16x32xbf16>, vector<16x32xf32> -> vector<16x32xf32>
    %102 = arith.truncf %101 : vector<16x32xf32> to vector<16x32xbf16>
    %cst_52 = arith.constant dense<0.000000e+00> : vector<16x32xf32>
    %103 = tpu.matmul %102, %10, %cst_52 {dimension_numbers = #tpu.dot_dimension_numbers<[1], [0], [0], [1], [0, 0, 1, 1], [], []>} : vector<16x32xbf16>, vector<32x32xbf16>, vector<16x32xf32> -> vector<16x32xf32>
    %104 = arith.addf %70, %103 : vector<16x32xf32>
    %105 = vector.broadcast %5 : vector<1x32xf32> to vector<16x32xf32>
    %106 = arith.addf %104, %105 : vector<16x32xf32>
    %107 = arith.negf %106 : vector<16x32xf32>
    %108 = math.exp %107 : vector<16x32xf32>
    %cst_53 = arith.constant 1.000000e+00 : f32
    %109 = vector.broadcast %cst_53 : f32 to vector<16x32xf32>
    %110 = arith.addf %109, %108 : vector<16x32xf32>
    %111 = arith.divf %109, %110 : vector<16x32xf32>
    %112 = arith.mulf %111, %60 : vector<16x32xf32>
    %cst_54 = arith.constant 1.000000e+00 : f32
    %113 = vector.broadcast %cst_54 : f32 to vector<16x32xf32>
    %114 = arith.subf %113, %111 : vector<16x32xf32>
    %115 = arith.mulf %114, %101 : vector<16x32xf32>
    %116 = arith.addf %112, %115 : vector<16x32xf32>
    %117 = tpu.concatenate %73, %73 in 0 : vector<32x16xf32>, vector<32x16xf32> -> vector<64x16xf32>
    %118 = arith.mulf %117, %19 : vector<64x16xf32>
    %119 = arith.truncf %118 : vector<64x16xf32> to vector<64x16xbf16>
    %120 = tpu.concatenate %68, %68 in 0 : vector<16x16xf32>, vector<16x16xf32> -> vector<32x16xf32>
    %121 = arith.truncf %120 : vector<32x16xf32> to vector<32x16xbf16>
    %122 = tpu.concatenate %69, %69 in 0 : vector<16x16xf32>, vector<16x16xf32> -> vector<32x16xf32>
    %123 = arith.mulf %122, %18 : vector<32x16xf32>
    %124 = arith.truncf %123 : vector<32x16xf32> to vector<32x16xbf16>
    %cst_55 = arith.constant dense<0.000000e+00> : vector<64x32xf32>
    %125 = tpu.matmul %119, %121, %cst_55 {dimension_numbers = #tpu.dot_dimension_numbers<[1], [1], [0], [0], [0, 0, 1, 0], [], []>} : vector<64x16xbf16>, vector<32x16xbf16>, vector<64x32xf32> -> vector<64x32xf32>
    %c0_56 = arith.constant 0 : index
    %c0_57 = arith.constant 0 : index
    %126 = vector.load %arg15[%c0_56, %c0_57] : memref<64x32xf32, #tpu.memory_space<vmem>>, vector<64x32xf32>
    %127 = arith.addf %125, %126 : vector<64x32xf32>
    %cst_58 = arith.constant dense<0xFF800000> : vector<64xf32>
    %128 = vector.multi_reduction <maximumf>, %127, %cst_58 [1] : vector<64x32xf32> to vector<64xf32>
    %129 = vector.shape_cast %128 : vector<64xf32> to vector<64x1xf32>
    %130 = vector.broadcast %129 : vector<64x1xf32> to vector<64x32xf32>
    %131 = arith.subf %127, %130 : vector<64x32xf32>
    %132 = math.exp %131 : vector<64x32xf32>
    %cst_59 = arith.constant dense<0.000000e+00> : vector<64xf32>
    %133 = vector.multi_reduction <add>, %132, %cst_59 [1] : vector<64x32xf32> to vector<64xf32>
    %134 = vector.shape_cast %133 : vector<64xf32> to vector<64x1xf32>
    %135 = tpu.reciprocal %134 {approx = true} : vector<64x1xf32> -> vector<64x1xf32>
    %136 = vector.broadcast %135 : vector<64x1xf32> to vector<64x32xf32>
    %137 = arith.mulf %132, %136 : vector<64x32xf32>
    %138 = arith.truncf %137 : vector<64x32xf32> to vector<64x32xbf16>
    %cst_60 = arith.constant dense<0.000000e+00> : vector<64x16xf32>
    %139 = tpu.matmul %138, %124, %cst_60 {dimension_numbers = #tpu.dot_dimension_numbers<[1], [0], [0], [1], [0, 0, 1, 1], [], []>} : vector<64x32xbf16>, vector<32x16xbf16>, vector<64x16xf32> -> vector<64x16xf32>
    %140 = vector.shape_cast %139 : vector<64x16xf32> to vector<2x32x16xf32>
    %cst_61 = arith.constant dense<0.000000e+00> : vector<32x16xf32>
    %141 = vector.multi_reduction <add>, %140, %cst_61 [0] : vector<2x32x16xf32> to vector<32x16xf32>
    %142 = arith.truncf %141 : vector<32x16xf32> to vector<32x16xbf16>
    %cst_62 = arith.constant dense<0.000000e+00> : vector<32x32xf32>
    %143 = tpu.matmul %142, %16, %cst_62 {dimension_numbers = #tpu.dot_dimension_numbers<[1], [0], [0], [1], [0, 0, 1, 1], [], []>} : vector<32x16xbf16>, vector<16x32xbf16>, vector<32x32xf32> -> vector<32x32xf32>
    %144 = arith.truncf %143 : vector<32x32xf32> to vector<32x32xbf16>
    %cst_63 = arith.constant dense<0.000000e+00> : vector<32x32xf32>
    %145 = tpu.matmul %144, %12, %cst_63 {dimension_numbers = #tpu.dot_dimension_numbers<[1], [0], [0], [1], [0, 0, 1, 1], [], []>} : vector<32x32xbf16>, vector<32x32xbf16>, vector<32x32xf32> -> vector<32x32xf32>
    %146 = arith.addf %74, %145 : vector<32x32xf32>
    %147 = vector.broadcast %6 : vector<1x32xf32> to vector<32x32xf32>
    %148 = arith.addf %146, %147 : vector<32x32xf32>
    %149 = arith.negf %148 : vector<32x32xf32>
    %150 = math.exp %149 : vector<32x32xf32>
    %cst_64 = arith.constant 1.000000e+00 : f32
    %151 = vector.broadcast %cst_64 : f32 to vector<32x32xf32>
    %152 = arith.addf %151, %150 : vector<32x32xf32>
    %153 = arith.divf %151, %152 : vector<32x32xf32>
    %cst_65 = arith.constant 1.000000e+00 : f32
    %154 = vector.broadcast %cst_65 : f32 to vector<32x32xf32>
    %155 = arith.subf %154, %153 : vector<32x32xf32>
    %156 = arith.mulf %155, %1 : vector<32x32xf32>
    %157 = math.tanh %143 : vector<32x32xf32>
    %158 = arith.mulf %153, %157 : vector<32x32xf32>
    %159 = arith.addf %156, %158 : vector<32x32xf32>
    %160 = tpu.concatenate %116, %159 in 0 : vector<16x32xf32>, vector<32x32xf32> -> vector<48x32xf32>
    %c0_66 = arith.constant 0 : index
    %c0_67 = arith.constant 0 : index
    %161 = vector.load %arg16[%c0_66, %c0_67] : memref<48x32xf32, #tpu.memory_space<vmem>>, vector<48x32xf32>
    tpu.vector_store %arg16[%c0_66, %c0_67], %160 {strides = array<i32>} : memref<48x32xf32, #tpu.memory_space<vmem>>, vector<48x32xf32>,
    return
  }
}

</mosaic_0001>

<bundles_post_ra>
// kernel: tpu_custom_call.1
= control target key start
LH: loop header
LB: loop body
LE: loop exit
PB: predicated region body
PF: predicated region fallthrough
CT: control target
= control target key end

     0   :  { %s2499_s0 = inlined_call_operand.vmem [shape: f32[16,32], index: 0, kind: input, shape index: {}]   ;;  %s2500_s1 = inlined_call_operand.vmem [shape: f32[32,32], index: 1, kind: input, shape index: {}]   ;;  %s2501_s2 = inlined_call_operand.vmem [shape: f32[16,32], index: 2, kind: input, shape index: {}]   ;;  %s2502_s3 = inlined_call_operand.vmem [shape: f32[16,32], index: 3, kind: input, shape index: {}]   ;;  %s2503_s4 = inlined_call_operand.vmem [shape: bf16[32,160], index: 4, kind: input, shape index: {}]   ;;  %s2504_s5 = inlined_call_operand.hbm [shape: bf16[32,80], index: 5, kind: input, shape index: {}]   ;;  %s2505_s6 = inlined_call_operand.hbm [shape: bf16[32,80], index: 6, kind: input, shape index: {}]   ;;  %s2506_s7 = inlined_call_operand.vmem [shape: bf16[3,32,32], index: 7, kind: input, shape index: {}]   ;;  %s2507_s8 = inlined_call_operand.hbm [shape: bf16[2,16,32], index: 8, kind: input, shape index: {}]   ;;  %s2508_s9 = inlined_call_operand.vmem [shape: f32[2,32], index: 9, kind: input, shape index: {}]   ;;  %s2509_s10 = inlined_call_operand.vmem [shape: f32[64,32], index: 10, kind: input, shape index: {}]   ;;  %s2510_s11 = inlined_call_operand.vmem [shape: f32[32,16], index: 11, kind: input, shape index: {}]   ;;  %s2511_s12 = inlined_call_operand.vmem [shape: f32[64,16], index: 12, kind: input, shape index: {}]   ;;  %s2512_s13 = inlined_call_operand.vmem [shape: f32[64,64], index: 13, kind: input, shape index: {}]   ;;  %s2513_s14 = inlined_call_operand.vmem [shape: f32[32,64], index: 14, kind: input, shape index: {}]   ;;  %s2514_s15 = inlined_call_operand.vmem [shape: f32[64,32], index: 15, kind: input, shape index: {}]   ;;  %s2515_s16 = inlined_call_operand.vmem [shape: f32[48,32], index: 16, kind: output, shape index: {}]  }
   0x1   :  { %2517 = sst [smem:[#allocation9_spill]] %s2499_s0 }
   0x2   :  { %21 = vsyncpa [#allocation3], 0 }
   0x3   :  { %22 = vsyncpa [#allocation5], 0  ;;  %s50_s23 = sshll.u32 %s2505_s6, 4  ;;  %s1776_s24 = smov [#allocation4]   ;;  %s51_s23 = int_to_ptr.hbm [resolvable:$true] %s50_s23 }
   0x4   :  { %s52_s25 = sshll.u32 %s1776_s24, 4  ;;  %s37_s28 = sshll.u32 %s2504_s5, 4  ;;  %s53_s25 = int_to_ptr.vmem [resolvable:$true] %s52_s25  ;;  %s38_s28 = int_to_ptr.hbm [resolvable:$true] %s37_s28 }
   0x5   :  { %s1777_s29 = smov 64   ;;  %s1778_s30 = smov 4  }
   0x6   :  { %58 = dma.hbm_to_vmem [thread:$0]  %s51_s23, 256, %s53_s25, [#allocation5], %s1777_s29, %s1777_s29, %s1778_s30  }
   0x7   :  { %s1779_s0 = smov [#allocation2]   ;;  %s65_s6 = sshll.u32 %s2507_s8, 4  ;;  %s66_s6 = int_to_ptr.hbm [resolvable:$true] %s65_s6 }
   0x8   :  { %s39_s17 = sshll.u32 %s1779_s0, 4  ;;  %s1780_s20 = smov [#allocation6]   ;;  %s40_s17 = int_to_ptr.vmem [resolvable:$true] %s39_s17 }
   0x9   :  { %45 = dma.hbm_to_vmem [thread:$0]  %s38_s28, 256, %s40_s17, [#allocation3], %s1777_s29, %s1777_s29, %s1778_s30  }
   0xa   :  { %s67_s21 = sshll.u32 %s1780_s20, 4  ;;  %s68_s21 = int_to_ptr.vmem [resolvable:$true] %s67_s21 }
   0xb   :  { %73 = dma.hbm_to_vmem [thread:$0]  %s66_s6, 256, %s68_s21, [#allocation5], %s1777_s29, %s1777_s29, %s1778_s30  }
   0xc   :  { %1772 = dma.done.wait [#allocation3], 256  }
   0xd   :  { %1773 = vsyncadd [#allocation3], 4294967040 }
   0xe   :  { %1774 = dma.done.wait [#allocation5], 512  }
   0xf   :  { %1775 = vsyncadd [#allocation5], 4294966784  ;;  %v1469_v0 = vld [vmem:[%s2503_s4 + $0x10] sm:$0xf]  ;;  %v1572_v1 = vld [vmem:[%s2503_s4 + $0x14] sm:$0xf0] }
  0x10   :  { %v109_v2 = vld [vmem:[%s2502_s3] sm:$0xff]  ;;  %v1470_v3 = vor.u32 %v1572_v1, %v1469_v0  ;;  %s1781_s26 = smov 96   ;;  %v1570_v5 = vld [vmem:[%s2503_s4 + $0x4] sm:$0xf0]  ;;  %s2518_s20 = sld [smem:[#allocation9_spill]]  ;;  %vm176_vm0 = vcmask 261120  }
  0x11   :  { %240 = vrot.lane.b32.xlu0 %v109_v2, %s1781_s26  ;;  %v1461_v4 = vld [vmem:[%s2503_s4] sm:$0xf]  ;;  %v110_v11 = vld [vmem:[%s2502_s3 + $0x8] sm:$0xff]  ;;  %s1782_s25 = smov 32   ;;  %v1949_v45 = vld [vmem:[%s2509_s10 + $0x18] sm:$0xff]  ;;  %vm338_vm1 = vcmask 523264  }
  0x12   :  { %v107_v6 = vld [vmem:[%s2501_s2] sm:$0xff]  ;;  %186 = vmatpush.bf16.msra.mxu0 %v1470_v3  ;;  %v1462_v7 = vor.u32 %v1570_v5, %v1461_v4  ;;  %v108_v12 = vld [vmem:[%s2501_s2 + $0x8] sm:$0xff]  ;;  %v1954_v46 = vld [vmem:[%s2509_s10 + $0x10] sm:$0xff]  ;;  %s1783_s3 = smov 16   ;;  %vm649_vm2 = vcmask 130048   ;;  %s1784_s6 = smov 112  }
  0x13   :  { %232 = vrot.lane.b32.xlu1 %v107_v6, %s1777_s29  ;;  %v1936_v39 = vld [vmem:[%s2509_s10 + $0x8] sm:$0xff]  ;;  %v1941_v41 = vld [vmem:[%s2509_s10] sm:$0xff]  ;;  %v1975_v55 = vld [vmem:[%s2509_s10 + $0x38] sm:$0xff] }
  0x14   :  { %v1962_v50 = vld [vmem:[%s2509_s10 + $0x28] sm:$0xff]  ;;  %v1967_v51 = vld [vmem:[%s2509_s10 + $0x20] sm:$0xff]  ;;  %v1980_v56 = vld [vmem:[%s2509_s10 + $0x30] sm:$0xff] }
  0x15   :  { %v283_v60 = vld [vmem:[%s2512_s13] sm:$0xff]  ;;  %v284_v0 = vld [vmem:[%s2512_s13 + $0x8] sm:$0xff]  ;;  %v285_v4 = vld [vmem:[%s2512_s13 + $0x10] sm:$0xff] }
  0x16   :  { %v101_v8 = vld [vmem:[%s2518_s20] sm:$0xff]  ;;  %v102_v9 = vld [vmem:[%s2518_s20 + $0x8] sm:$0xff]  ;;  %187 = vmatpush.bf16.msra.mxu0 %v1462_v7 }
  0x17   :  { %v1913_v10 = vpack.c.bf16 %v102_v9, %v101_v8  ;;  %v286_v8 = vld [vmem:[%s2512_s13 + $0x18] sm:$0xff] }
  0x19   :  { %242 = vrot.lane.b32.xlu0 %v110_v11, %s1781_s26  ;;  %1475 = vmatmul.msk.bf16.vlgmr.msra.gmra.mxu0 %vm176_vm0, %v1913_v10 }
  0x1b   :  { %234 = vrot.lane.b32.xlu1 %v108_v12, %s1777_s29 }
  0x21   :  { %212 = vrot.lane.b32.xlu0 %v109_v2, %s1782_s25 }
  0x23   :  { %214 = vrot.lane.b32.xlu1 %v110_v11, %s1782_s25 }
  0x83   :  { %v241_v13 = vpop.permute.xlu0 %240 }
  0x85   :  { %v233_v14 = vpop.permute.xlu1 %232 }
  0x8b   :  { %v243_v15 = vpop.permute.xlu0 %242 }
  0x8d   :  { %v235_v16 = vpop.permute.xlu1 %234 }
  0x93   :  { %v213_v17 = vpop.permute.xlu0 %212 }
  0x95   :  { %v215_v22 = vpop.permute.xlu1 %214 }
  0x96   :  { %v189_v18 = vpop.f32.mrf.mxu0 }
  0x97   :  { %v246_v19 = vmul.f32 %v241_v13, %v189_v18  ;;  %v218_v20 = vmul.f32 %v213_v17, %v189_v18  ;;  %v238_v21 = vmul.f32 %v233_v14, %v189_v18  ;;  %v208_v37 = vmul.f32 %v189_v18, %v107_v6  ;;  %v1571_v13 = vld [vmem:[%s2503_s4 + $0x14] sm:$0xf]  ;;  %v1471_v14 = vld [vmem:[%s2503_s4 + $0x18] sm:$0xf0]  ;;  %v1463_v17 = vld [vmem:[%s2503_s4 + $0x8] sm:$0xf0] }
  0x98   :  { %v287_v18 = vld [vmem:[%s2512_s13 + $0x20] sm:$0xff] }
  0x99   :  { %250 = vrot.lane.b32.xlu2 %v246_v19, %s1781_s26  ;;  %222 = vrot.lane.b32.xlu0 %v218_v20, %s1781_s26 }
  0x9e   :  { %v191_v23 = vpop.f32.mrf.mxu0 }
  0x9f   :  { %v247_v24 = vmul.f32 %v243_v15, %v191_v23  ;;  %v219_v25 = vmul.f32 %v215_v22, %v191_v23  ;;  %v239_v27 = vmul.f32 %v235_v16, %v191_v23  ;;  %v209_v35 = vmul.f32 %v191_v23, %v108_v12  ;;  %v1569_v15 = vld [vmem:[%s2503_s4 + $0x4] sm:$0xf]  ;;  %v288_v23 = vld [vmem:[%s2512_s13 + $0x28] sm:$0xff] }
  0xa0   :  { %v1474_v16 = vor.u32 %v1571_v13, %v1471_v14  ;;  %v1466_v19 = vor.u32 %v1569_v15, %v1463_v17 }
  0xa1   :  { %252 = vrot.lane.b32.xlu2 %v247_v24, %s1781_s26  ;;  %224 = vrot.lane.b32.xlu1 %v219_v25, %s1781_s26 }
  0xa2   :  { %200 = vmatpush.bf16.msra.mxu1 %v1474_v16 }
  0xa6   :  { %201 = vmatpush.bf16.msra.mxu1 %v1466_v19 }
  0xa9   :  { %1476 = vmatmul.msk.bf16.vlgmr.msra.gmra.mxu1 %vm176_vm0, %v1913_v10 }
  0xf3   :  { %v251_v26 = vpop.permute.xlu2 %250 }
  0xf4   :  { %v256_v29 = vadd.f32 %v251_v26, %v238_v21 }
  0xfb   :  { %v253_v28 = vpop.permute.xlu2 %252 }
  0xfc   :  { %v257_v30 = vadd.f32 %v253_v28, %v239_v27  ;;  %v289_v27 = vld [vmem:[%s2512_s13 + $0x30] sm:$0xff] }
  0xfe   :  { %v270_v31 = vpack.c.bf16 %v257_v30, %v256_v29 }
 0x100   :  { %292 = vrot.lane.b32.xlu2 %v270_v31, %s1777_s29  ;;  %v290_v31 = vld [vmem:[%s2512_s13 + $0x38] sm:$0xff] }
 0x10b   :  { %v223_v36 = vpop.permute.xlu0 %222 }
 0x10c   :  { %v228_v40 = vadd.f32 %v223_v36, %v208_v37 }
 0x10e   :  { %v258_v43 = vmul.f32 %v228_v40, %v1941_v41  ;;  %v260_v48 = vmul.f32 %v228_v40, %v1954_v46  ;;  %v262_v53 = vmul.f32 %v228_v40, %v1967_v51  ;;  %v264_v58 = vmul.f32 %v228_v40, %v1980_v56 }
 0x113   :  { %v225_v34 = vpop.permute.xlu1 %224 }
 0x114   :  { %v229_v38 = vadd.f32 %v225_v34, %v209_v35 }
 0x116   :  { %v259_v42 = vmul.f32 %v229_v38, %v1936_v39  ;;  %v261_v47 = vmul.f32 %v229_v38, %v1949_v45  ;;  %v263_v52 = vmul.f32 %v229_v38, %v1962_v50  ;;  %v265_v57 = vmul.f32 %v229_v38, %v1975_v55 }
 0x118   :  { %v266_v44 = vpack.c.bf16 %v259_v42, %v258_v43  ;;  %v267_v49 = vpack.c.bf16 %v261_v47, %v260_v48  ;;  %v268_v54 = vpack.c.bf16 %v263_v52, %v262_v53  ;;  %v269_v59 = vpack.c.bf16 %v265_v57, %v264_v58 }
 0x15a   :  { %v293_v32 = vpop.permute.xlu2 %292 }
 0x15b   :  { %v307_v33 = vsel %vm176_vm0, %v293_v32, 0 }
 0x15c   :  { %313 = vmatpush.bf16.xpose.msra.mxu2 %v307_v33 }
 0x164   :  { %314 = vmatpush.bf16.xpose.msra.mxu2 %v307_v33 }
 0x16c   :  { %315 = vmatpush.bf16.xpose.msra.mxu2 %v307_v33 }
 0x174   :  { %316 = vmatpush.bf16.xpose.msra.mxu2 %v307_v33 }
 0x17b   :  { %1477 = vmatmul.msk.bf16.vlgmr.msra.gmra.mxu2 %vm176_vm0, %v266_v44 }
 0x18b   :  { %1478 = vmatmul.msk.bf16.gmra.mxu2 %vm176_vm0, %v267_v49 }
 0x19b   :  { %1479 = vmatmul.msk.bf16.gmra.mxu2 %vm176_vm0, %v268_v54 }
 0x1ab   :  { %1480 = vmatmul.msk.bf16.gmra.mxu2 %vm176_vm0, %v269_v59 }
 0x1fe   :  { %v318_v61 = vpop.f32.mrf.mxu2 }
 0x1ff   :  { %v319_v62 = vadd.f32 %v318_v61, %v283_v60 }
 0x201   :  { %v339_v63 = vsel %vm338_vm1, %v319_v62, -inf }
 0x202   :  { %340 = vmax.xlane.f32.xlu2 %v339_v63 }
 0x206   :  { %v320_v1 = vpop.f32.mrf.mxu2 }
 0x207   :  { %v321_v2 = vadd.f32 %v320_v1, %v284_v0 }
 0x209   :  { %v342_v3 = vsel %vm338_vm1, %v321_v2, -inf }
 0x20a   :  { %343 = vmax.xlane.f32.xlu0 %v342_v3 }
 0x20e   :  { %v323_v5 = vpop.f32.mrf.mxu2 }
 0x20f   :  { %v324_v6 = vadd.f32 %v323_v5, %v285_v4 }
 0x211   :  { %v345_v7 = vsel %vm338_vm1, %v324_v6, -inf }
 0x212   :  { %346 = vmax.xlane.f32.xlu1 %v345_v7 }
 0x216   :  { %v325_v9 = vpop.f32.mrf.mxu2 }
 0x217   :  { %v326_v11 = vadd.f32 %v325_v9, %v286_v8 }
 0x219   :  { %v348_v12 = vsel %vm338_vm1, %v326_v11, -inf }
 0x21a   :  { %349 = vmax.xlane.f32.xlu2 %v348_v12 }
 0x21e   :  { %v328_v20 = vpop.f32.mrf.mxu2 }
 0x21f   :  { %v329_v21 = vadd.f32 %v328_v20, %v287_v18 }
 0x221   :  { %v351_v22 = vsel %vm338_vm1, %v329_v21, -inf }
 0x222   :  { %352 = vmax.xlane.f32.xlu2 %v351_v22 }
 0x226   :  { %v330_v24 = vpop.f32.mrf.mxu2 }
 0x227   :  { %v331_v25 = vadd.f32 %v330_v24, %v288_v23 }
 0x229   :  { %v354_v26 = vsel %vm338_vm1, %v331_v25, -inf }
 0x22a   :  { %355 = vmax.xlane.f32.xlu0 %v354_v26 }
 0x22e   :  { %v333_v28 = vpop.f32.mrf.mxu2 }
 0x22f   :  { %v334_v29 = vadd.f32 %v333_v28, %v289_v27 }
 0x231   :  { %v357_v30 = vsel %vm338_vm1, %v334_v29, -inf }
 0x232   :  { %358 = vmax.xlane.f32.xlu1 %v357_v30 }
 0x236   :  { %v335_v32 = vpop.f32.mrf.mxu2 }
 0x237   :  { %v2030_v10 = vadd.f32 %v335_v32, %v290_v31 }
 0x239   :  { %v360_v33 = vsel %vm338_vm1, %v2030_v10, -inf }
 0x23a   :  { %361 = vmax.xlane.f32.xlu2 %v360_v33 }
 0x275   :  { %v341_v34 = vpop.xlane.xlu2 %340 }
 0x276   :  { %v363_v35 = vsub.f32 %v319_v62, %v341_v34 }
 0x278   :  { %v371_v36 = vmul.f32 1.442695, %v363_v35 }
 0x27a   :  { %1588 = vpow2.f32 %v371_v36 }
 0x27d   :  { %v344_v37 = vpop.xlane.xlu0 %343 }
 0x27e   :  { %v364_v38 = vsub.f32 %v321_v2, %v344_v37 }
 0x280   :  { %v2034_v40 = vpop.eup %1588  ;;  %v373_v42 = vmul.f32 1.442695, %v364_v38 }
 0x281   :  { %v387_v43 = vsel %vm338_vm1, %v2034_v40, 0.0 }
 0x282   :  { %1590 = vpow2.f32 %v373_v42  ;;  %388 = vadd.xlane.f32.xlu0 %v387_v43 }
 0x285   :  { %v347_v44 = vpop.xlane.xlu1 %346 }
 0x286   :  { %v365_v47 = vsub.f32 %v324_v6, %v347_v44  ;;  %v203_v6 = vpop.f32.mrf.mxu1 }
 0x287   :  { %v277_v12 = vmul.f32 %v203_v6, %v1980_v56  ;;  %v275_v16 = vmul.f32 %v203_v6, %v1967_v51  ;;  %v273_v22 = vmul.f32 %v203_v6, %v1954_v46 }
 0x288   :  { %v2038_v48 = vpop.eup %1590  ;;  %v375_v49 = vmul.f32 1.442695, %v365_v47 }
 0x289   :  { %v390_v52 = vsel %vm338_vm1, %v2038_v48, 0.0 }
 0x28a   :  { %1592 = vpow2.f32 %v375_v49  ;;  %391 = vadd.xlane.f32.xlu1 %v390_v52 }
 0x28d   :  { %v350_v53 = vpop.xlane.xlu2 %349 }
 0x28e   :  { %v366_v54 = vsub.f32 %v326_v11, %v350_v53  ;;  %v205_v14 = vpop.f32.mrf.mxu1 }
 0x28f   :  { %v278_v15 = vmul.f32 %v205_v14, %v1975_v55  ;;  %v276_v17 = vmul.f32 %v205_v14, %v1962_v50  ;;  %v274_v56 = vmul.f32 %v205_v14, %v1949_v45  ;;  %v271_v50 = vmul.f32 %v203_v6, %v1941_v41  ;;  %v144_v6 = vld [vmem:[%s2511_s12 + $0x8] sm:$0xff] }
 0x290   :  { %v2042_v57 = vpop.eup %1592  ;;  %v377_v58 = vmul.f32 1.442695, %v366_v54  ;;  %v272_v55 = vmul.f32 %v205_v14, %v1936_v39 }
 0x291   :  { %v393_v59 = vsel %vm338_vm1, %v2042_v57, 0.0  ;;  %v282_v18 = vpack.c.bf16 %v278_v15, %v277_v12  ;;  %v280_v51 = vpack.c.bf16 %v274_v56, %v273_v22 }
 0x292   :  { %1594 = vpow2.f32 %v377_v58  ;;  %394 = vadd.xlane.f32.xlu2 %v393_v59  ;;  %v279_v26 = vpack.c.bf16 %v272_v55, %v271_v50  ;;  %v143_v50 = vld [vmem:[%s2511_s12] sm:$0xff]  ;;  %v150_v55 = vld [vmem:[%s2511_s12 + $0x38] sm:$0xff] }
 0x293   :  { %447 = vmatpush.bf16.msra.mxu3 %v282_v18 }
 0x295   :  { %v353_v60 = vpop.xlane.xlu2 %352 }
 0x296   :  { %v367_v61 = vsub.f32 %v329_v21, %v353_v60  ;;  %v281_v21 = vpack.c.bf16 %v276_v17, %v275_v16 }
 0x298   :  { %v2046_v62 = vpop.eup %1594  ;;  %v379_v63 = vmul.f32 1.442695, %v367_v61  ;;  %448 = vmatpush.bf16.msra.mxu3 %v281_v21 }
 0x299   :  { %v396_v0 = vsel %vm338_vm1, %v2046_v62, 0.0 }
 0x29a   :  { %1596 = vpow2.f32 %v379_v63  ;;  %397 = vadd.xlane.f32.xlu0 %v396_v0  ;;  %v1561_v0 = vld [vmem:[%s2506_s7] sm:$0xff] }
 0x29c   :  { %449 = vmatpush.bf16.msra.mxu3 %v280_v51  ;;  %v145_v51 = vld [vmem:[%s2511_s12 + $0x10] sm:$0xff] }
 0x29d   :  { %v356_v1 = vpop.xlane.xlu0 %355 }
 0x29e   :  { %v368_v2 = vsub.f32 %v331_v25, %v356_v1 }
 0x2a0   :  { %v2050_v3 = vpop.eup %1596  ;;  %v381_v4 = vmul.f32 1.442695, %v368_v2  ;;  %450 = vmatpush.bf16.msra.mxu3 %v279_v26  ;;  %v1576_v2 = vld [vmem:[#allocation4 + $0x8] sm:$0xff]  ;;  %v147_v26 = vld [vmem:[%s2511_s12 + $0x20] sm:$0xff] }
 0x2a1   :  { %v399_v5 = vsel %vm338_vm1, %v2050_v3, 0.0 }
 0x2a2   :  { %1598 = vpow2.f32 %v381_v4  ;;  %400 = vadd.xlane.f32.xlu1 %v399_v5  ;;  %v1575_v4 = vld [vmem:[#allocation4] sm:$0xff] }
 0x2a5   :  { %v359_v7 = vpop.xlane.xlu1 %358 }
 0x2a6   :  { %v369_v8 = vsub.f32 %v334_v29, %v359_v7 }
 0x2a8   :  { %v1599_v9 = vpop.eup %1598  ;;  %v383_v11 = vmul.f32 1.442695, %v369_v8 }
 0x2a9   :  { %v402_v13 = vsel %vm338_vm1, %v1599_v9, 0.0 }
 0x2aa   :  { %1600 = vpow2.f32 %v383_v11  ;;  %403 = vadd.xlane.f32.xlu2 %v402_v13  ;;  %v146_v11 = vld [vmem:[%s2511_s12 + $0x18] sm:$0xff] }
 0x2ad   :  { %v362_v19 = vpop.xlane.xlu2 %361 }
 0x2ae   :  { %v370_v20 = vsub.f32 %v2030_v10, %v362_v19 }
 0x2b0   :  { %v1601_v23 = vpop.eup %1600  ;;  %v385_v24 = vmul.f32 1.442695, %v370_v20 }
 0x2b1   :  { %v405_v25 = vsel %vm338_vm1, %v1601_v23, 0.0 }
 0x2b2   :  { %1602 = vpow2.f32 %v385_v24  ;;  %406 = vadd.xlane.f32.xlu0 %v405_v25  ;;  %v148_v25 = vld [vmem:[%s2511_s12 + $0x28] sm:$0xff] }
 0x2b8   :  { %v1603_v27 = vpop.eup %1602 }
 0x2b9   :  { %v408_v28 = vsel %vm338_vm1, %v1603_v27, 0.0 }
 0x2ba   :  { %409 = vadd.xlane.f32.xlu1 %v408_v28  ;;  %v2124_v28 = vld [vmem:[%s2500_s1 + $0x8] sm:$0xff] }
 0x2c2   :  { %907 = vrot.lane.b32.xlu2 %v143_v50, %s1782_s25 }
 0x2c6   :  { %909 = vrot.lane.b32.xlu0 %v144_v6, %s1782_s25 }
 0x2ca   :  { %613 = vrot.lane.b32.xlu2 %v145_v51, %s1783_s3 }
 0x2ce   :  { %913 = vrot.lane.b32.xlu0 %v146_v11, %s1782_s25 }
 0x2d3   :  { %911 = vrot.lane.b32.xlu1 %v145_v51, %s1782_s25 }
 0x2d6   :  { %917 = vrot.lane.b32.xlu0 %v148_v25, %s1782_s25 }
 0x2db   :  { %915 = vrot.lane.b32.xlu1 %v147_v26, %s1782_s25 }
 0x2de   :  { %921 = vrot.lane.b32.xlu0 %v150_v55, %s1782_s25 }
 0x2f5   :  { %v389_v45 = vpop.xlane.xlu0 %388 }
 0x2f6   :  { %1604 = vrcp.f32 %v389_v45  ;;  %v1574_v45 = vld [vmem:[#allocation2 + $0x8] sm:$0xff] }
 0x2f7   :  { %542 = vmatpush.bf16.msrb.mxu1 %v1574_v45  ;;  %v645_v45 = vld [vmem:[%s2513_s14] sm:$0xff] }
 0x2fc   :  { %v1605_v29 = vpop.eup %1604 }
 0x2fd   :  { %v392_v46 = vpop.xlane.xlu1 %391  ;;  %v419_v31 = vmul.f32 %v1605_v29, %v2034_v40  ;;  %v149_v29 = vld [vmem:[%s2511_s12 + $0x30] sm:$0xff] }
 0x2fe   :  { %1606 = vrcp.f32 %v392_v46  ;;  %621 = vrot.lane.b32.xlu0 %v149_v29, %s1783_s3  ;;  %919 = vrot.lane.b32.xlu1 %v149_v29, %s1782_s25 }
 0x304   :  { %v1607_v30 = vpop.eup %1606 }
 0x305   :  { %v420_v32 = vmul.f32 %v1607_v30, %v2038_v48  ;;  %v395_v10 = vpop.xlane.xlu2 %394  ;;  %v2138_v30 = vld [vmem:[%s2500_s1 + $0x10] sm:$0xff] }
 0x306   :  { %1608 = vrcp.f32 %v395_v10  ;;  %623 = vrot.lane.b32.xlu0 %v150_v55, %s1783_s3  ;;  %615 = vrot.lane.b32.xlu1 %v146_v11, %s1783_s3 }
 0x307   :  { %v427_v41 = vpack.c.bf16 %v420_v32, %v419_v31  ;;  %v2143_v31 = vld [vmem:[%s2500_s1 + $0x18] sm:$0xff] }
 0x308   :  { %v551_v32 = vpack.c.bf16 %v2143_v31, %v2138_v30 }
 0x309   :  { %1481 = vmatmul.msk.bf16.vlgmr.msra.gmra.mxu3 %vm338_vm1, %v427_v41  ;;  %v1573_v41 = vld [vmem:[#allocation2] sm:$0xff] }
 0x30a   :  { %543 = vmatpush.bf16.msrb.mxu1 %v1573_v41 }
 0x30c   :  { %v1609_v33 = vpop.eup %1608 }
 0x30d   :  { %v398_v39 = vpop.xlane.xlu0 %397  ;;  %v421_v35 = vmul.f32 %v1609_v33, %v2042_v57 }
 0x30e   :  { %1610 = vrcp.f32 %v398_v39  ;;  %617 = vrot.lane.b32.xlu0 %v147_v26, %s1783_s3  ;;  %609 = vrot.lane.b32.xlu1 %v143_v50, %s1783_s3 }
 0x314   :  { %v1611_v34 = vpop.eup %1610 }
 0x315   :  { %v422_v36 = vmul.f32 %v1611_v34, %v2046_v62  ;;  %v401_v38 = vpop.xlane.xlu1 %400  ;;  %v1562_v62 = vld [vmem:[%s2506_s7 + $0x8] sm:$0xff] }
 0x316   :  { %1612 = vrcp.f32 %v401_v38  ;;  %508 = vmatpush.bf16.msrb.mxu0 %v1562_v62  ;;  %619 = vrot.lane.b32.xlu0 %v148_v25, %s1783_s3 }
 0x317   :  { %v428_v37 = vpack.c.bf16 %v422_v36, %v421_v35  ;;  %611 = vrot.lane.b32.xlu1 %v144_v6, %s1783_s3 }
 0x319   :  { %1482 = vmatmul.msk.bf16.gmra.mxu3 %vm338_vm1, %v428_v37 }
 0x31a   :  { %509 = vmatpush.bf16.msrb.mxu0 %v1561_v0 }
 0x31c   :  { %v1613_v42 = vpop.eup %1612 }
 0x31d   :  { %v404_v40 = vpop.xlane.xlu2 %403  ;;  %v423_v44 = vmul.f32 %v1613_v42, %v2050_v3 }
 0x31e   :  { %1614 = vrcp.f32 %v404_v40  ;;  %580 = vmatpush.bf16.msra.mxu0 %v1576_v2 }
 0x322   :  { %581 = vmatpush.bf16.msra.mxu0 %v1575_v4 }
 0x324   :  { %v1615_v43 = vpop.eup %1614 }
 0x325   :  { %v424_v47 = vmul.f32 %v1615_v43, %v1599_v9  ;;  %v407_v49 = vpop.xlane.xlu0 %406 }
 0x326   :  { %1616 = vrcp.f32 %v407_v49  ;;  %v908_v49 = vpop.permute.xlu2 %907 }
 0x327   :  { %v429_v48 = vpack.c.bf16 %v424_v47, %v423_v44 }
 0x329   :  { %1483 = vmatmul.msk.bf16.gmra.mxu3 %vm338_vm1, %v429_v48 }
 0x32c   :  { %v1617_v53 = vpop.eup %1616 }
 0x32d   :  { %v410_v52 = vpop.xlane.xlu1 %409  ;;  %v425_v57 = vmul.f32 %v1617_v53, %v1601_v23 }
 0x32e   :  { %1618 = vrcp.f32 %v410_v52 }
 0x334   :  { %v1619_v54 = vpop.eup %1618 }
 0x335   :  { %v426_v58 = vmul.f32 %v1619_v54, %v1603_v27  ;;  %v2119_v27 = vld [vmem:[%s2500_s1] sm:$0xff] }
 0x336   :  { %v550_v46 = vpack.c.bf16 %v2124_v28, %v2119_v27 }
 0x337   :  { %v430_v59 = vpack.c.bf16 %v426_v58, %v425_v57 }
 0x338   :  { %v910_v39 = vpop.permute.xlu0 %909 }
 0x339   :  { %1484 = vmatmul.msk.bf16.gmra.mxu3 %vm338_vm1, %v430_v59 }
 0x340   :  { %v914_v36 = vpop.permute.xlu0 %913 }
 0x345   :  { %v912_v35 = vpop.permute.xlu1 %911 }
 0x348   :  { %v918_v42 = vpop.permute.xlu0 %917 }
 0x34d   :  { %v916_v38 = vpop.permute.xlu1 %915 }
 0x370   :  { %v920_v0 = vpop.permute.xlu1 %919 }
 0x378   :  { %v2222_v51 = vpop.permute.xlu1 %615 }
 0x380   :  { %v610_v55 = vpop.permute.xlu1 %609 }
 0x38c   :  { %v452_v60 = vpop.f32.mrf.mxu3 }
 0x38d   :  { %v472_v12 = vsel %vm176_vm0, %v452_v60, 0.0 }
 0x394   :  { %v454_v61 = vpop.f32.mrf.mxu3 }
 0x395   :  { %v479_v13 = vsel %vm176_vm0, %v454_v61, 0.0 }
 0x39c   :  { %v457_v63 = vpop.f32.mrf.mxu3 }
 0x39d   :  { %v473_v8 = vsel %vm176_vm0, %v457_v63, 0.0  ;;  %v922_v63 = vpop.permute.xlu0 %921 }
 0x39e   :  { %v474_v16 = vadd.f32 %v473_v8, %v472_v12  ;;  %v2191_v8 = vld [vmem:[%s2510_s11 + $0x8] sm:$0xff] }
 0x3a4   :  { %v459_v1 = vpop.f32.mrf.mxu3 }
 0x3a5   :  { %v480_v9 = vsel %vm176_vm0, %v459_v1, 0.0 }
 0x3a6   :  { %v481_v17 = vadd.f32 %v480_v9, %v479_v13 }
 0x3ac   :  { %v462_v3 = vpop.f32.mrf.mxu3 }
 0x3ad   :  { %v475_v14 = vsel %vm176_vm0, %v462_v3, 0.0 }
 0x3ae   :  { %v476_v19 = vadd.f32 %v475_v14, %v474_v16  ;;  %v2211_v16 = vld [vmem:[%s2510_s11 + $0x10] sm:$0xff] }
 0x3b4   :  { %v464_v5 = vpop.f32.mrf.mxu3 }
 0x3b5   :  { %v482_v15 = vsel %vm176_vm0, %v464_v5, 0.0 }
 0x3b6   :  { %v483_v20 = vadd.f32 %v482_v15, %v481_v17  ;;  %v2206_v15 = vld [vmem:[%s2510_s11 + $0x18] sm:$0xff] }
 0x3bc   :  { %v467_v7 = vpop.f32.mrf.mxu3 }
 0x3bd   :  { %v477_v18 = vsel %vm176_vm0, %v467_v7, 0.0  ;;  %v2186_v7 = vld [vmem:[%s2510_s11] sm:$0xff]  ;;  %s1785_s11 = smov 48  }
 0x3be   :  { %v478_v56 = vadd.f32 %v477_v18, %v476_v19 }
 0x3c4   :  { %v469_v21 = vpop.f32.mrf.mxu3 }
 0x3c5   :  { %v484_v22 = vsel %vm176_vm0, %v469_v21, 0.0 }
 0x3c6   :  { %v485_v23 = vadd.f32 %v484_v22, %v483_v20  ;;  %v2218_v20 = vpop.permute.xlu2 %613  ;;  %v622_v22 = vpop.permute.xlu0 %621 }
 0x3c8   :  { %v486_v24 = vpack.c.bf16 %v485_v23, %v478_v56 }
 0x3ca   :  { %1493 = vmatmul.msk.bf16.vlgmr.msrb.gmra.mxu0 %vm176_vm0, %v486_v24 }
 0x3ce   :  { %v624_v24 = vpop.permute.xlu0 %623 }
 0x3d6   :  { %v618_v25 = vpop.permute.xlu0 %617 }
 0x3da   :  { %1511 = vmatmul.msk.bf16.vlgmr.msra.gmra.mxu0 %vm176_vm0, %v550_v46 }
 0x3de   :  { %v620_v50 = vpop.permute.xlu0 %619 }
 0x3ea   :  { %1512 = vmatmul.msk.bf16.gmra.mxu0 %vm176_vm0, %v551_v32  ;;  %v612_v32 = vpop.permute.xlu1 %611 }
 0x447   :  { %v2148_v10 = vpop.f32.mrf.mxu0 }
 0x44f   :  { %v2150_v33 = vpop.f32.mrf.mxu0 }
 0x450   :  { %v516_v34 = vpack.c.bf16 %v2150_v33, %v2148_v10 }
 0x452   :  { %1502 = vmatmul.msk.bf16.vlgmr.msrb.gmra.mxu1 %vm176_vm0, %v516_v34 }
 0x457   :  { %v2155_v37 = vpop.f32.mrf.mxu0 }
 0x458   :  { %v935_v40 = vmul.f32 %v916_v38, %v2155_v37  ;;  %v931_v52 = vmul.f32 %v908_v49, %v2155_v37 }
 0x45f   :  { %v2158_v43 = vpop.f32.mrf.mxu0 }
 0x460   :  { %v936_v44 = vmul.f32 %v918_v42, %v2158_v43  ;;  %v932_v48 = vmul.f32 %v910_v39, %v2158_v43  ;;  %v599_v2 = vpack.c.bf16 %v2158_v43, %v2155_v37  ;;  %v646_v39 = vld [vmem:[%s2513_s14 + $0x8] sm:$0xff] }
 0x462   :  { %v941_v47 = vpack.c.bf16 %v936_v44, %v935_v40  ;;  %v939_v53 = vpack.c.bf16 %v932_v48, %v931_v52  ;;  %v657_v4 = vsel %vm649_vm2, %v599_v2, 0  ;;  %v647_v40 = vld [vmem:[%s2513_s14 + $0x10] sm:$0xff]  ;;  %v648_v48 = vld [vmem:[%s2513_s14 + $0x18] sm:$0xff]  ;;  %v634_v2 = vmul.f32 %v612_v32, %v2158_v43 }
 0x464   :  { %982 = vrot.lane.b32.xlu1 %v941_v47, %s1781_s26  ;;  %978 = vrot.lane.b32.xlu2 %v939_v53, %s1781_s26 }
 0x467   :  { %v2164_v54 = vpop.f32.mrf.mxu0 }
 0x468   :  { %v933_v57 = vmul.f32 %v912_v35, %v2164_v54  ;;  %v937_v1 = vmul.f32 %v920_v0, %v2164_v54 }
 0x46f   :  { %v2168_v58 = vpop.f32.mrf.mxu0 }
 0x470   :  { %v600_v59 = vpack.c.bf16 %v2168_v58, %v2164_v54  ;;  %v934_v60 = vmul.f32 %v914_v36, %v2168_v58  ;;  %v938_v3 = vmul.f32 %v922_v63, %v2168_v58 }
 0x472   :  { %v660_v61 = vsel %vm649_vm2, %v600_v59, 0  ;;  %v940_v62 = vpack.c.bf16 %v934_v60, %v933_v57  ;;  %v942_v5 = vpack.c.bf16 %v938_v3, %v937_v1  ;;  %v639_v59 = vmul.f32 %v622_v22, %v2164_v54 }
 0x473   :  { %666 = vmatpush.bf16.xpose.msra.mxu1 %v660_v61  ;;  %v640_v60 = vmul.f32 %v624_v24, %v2168_v58  ;;  %v633_v1 = vmul.f32 %v610_v55, %v2155_v37 }
 0x474   :  { %980 = vrot.lane.b32.xlu0 %v940_v62, %s1781_s26  ;;  %v638_v62 = vmul.f32 %v620_v50, %v2158_v43 }
 0x475   :  { %v644_v63 = vpack.c.bf16 %v640_v60, %v639_v59  ;;  %v641_v3 = vpack.c.bf16 %v634_v2, %v633_v1 }
 0x47b   :  { %667 = vmatpush.bf16.xpose.msra.mxu1 %v657_v4 }
 0x47c   :  { %984 = vrot.lane.b32.xlu0 %v942_v5, %s1781_s26 }
 0x483   :  { %668 = vmatpush.bf16.xpose.msra.mxu1 %v660_v61  ;;  %v637_v61 = vmul.f32 %v618_v25, %v2155_v37 }
 0x485   :  { %v643_v0 = vpack.c.bf16 %v638_v62, %v637_v61 }
 0x48b   :  { %669 = vmatpush.bf16.xpose.msra.mxu1 %v657_v4 }
 0x4be   :  { %v979_v21 = vpop.permute.xlu2 %978 }
 0x4cf   :  { %v2181_v6 = vpop.f32.mrf.mxu1 }
 0x4d0   :  { %v593_v11 = vmul.f32 %v2181_v6, %v2186_v7  ;;  %v595_v18 = vmul.f32 %v2181_v6, %v2211_v16 }
 0x4d6   :  { %v983_v36 = vpop.permute.xlu1 %982 }
 0x4d7   :  { %v2193_v9 = vpop.f32.mrf.mxu1 }
 0x4d8   :  { %v594_v12 = vmul.f32 %v2193_v9, %v2191_v8  ;;  %v943_v13 = vpack.c.bf16 %v2193_v9, %v2181_v6  ;;  %v596_v17 = vmul.f32 %v2193_v9, %v2206_v15 }
 0x4da   :  { %987 = vrot.lane.b32.xlu2 %v943_v13, %s1784_s6  ;;  %v597_v14 = vpack.c.bf16 %v594_v12, %v593_v11  ;;  %v598_v19 = vpack.c.bf16 %v596_v17, %v595_v18 }
 0x4dc   :  { %1513 = vmatmul.msk.bf16.vlgmr.msra.gmra.mxu1 %vm649_vm2, %v597_v14 }
 0x4e6   :  { %v981_v26 = vpop.permute.xlu0 %980 }
 0x4ec   :  { %1514 = vmatmul.msk.bf16.gmra.mxu1 %vm649_vm2, %v598_v19 }
 0x4ee   :  { %v985_v53 = vpop.permute.xlu0 %984 }
 0x534   :  { %v988_v56 = vpop.permute.xlu2 %987 }
 0x535   :  { %v1002_v23 = vsel %vm649_vm2, %v988_v56, 0 }
 0x536   :  { %1010 = vmatpush.bf16.xpose.msrb.mxu2 %v1002_v23 }
 0x53e   :  { %1011 = vmatpush.bf16.xpose.msrb.mxu2 %v1002_v23 }
 0x545   :  { %1533 = vmatmul.msk.bf16.vlgmr.msrb.gmra.mxu2 %vm649_vm2, %v979_v21  ;;  %v966_v21 = vld [vmem:[%s2514_s15] sm:$0xff] }
 0x555   :  { %1534 = vmatmul.msk.bf16.gmra.mxu2 %vm649_vm2, %v981_v26  ;;  %v967_v26 = vld [vmem:[%s2514_s15 + $0x8] sm:$0xff] }
 0x559   :  { %v671_v46 = vpop.f32.mrf.mxu1 }
 0x55a   :  { %v672_v29 = vadd.f32 %v671_v46, %v645_v45 }
 0x55c   :  { %v681_v41 = vsel %vm338_vm1, %v672_v29, -inf }
 0x55d   :  { %682 = vmax.xlane.f32.xlu2 %v681_v41 }
 0x561   :  { %v673_v34 = vpop.f32.mrf.mxu1 }
 0x562   :  { %v674_v35 = vadd.f32 %v673_v34, %v646_v39 }
 0x564   :  { %v684_v38 = vsel %vm338_vm1, %v674_v35, -inf }
 0x565   :  { %685 = vmax.xlane.f32.xlu1 %v684_v38  ;;  %1535 = vmatmul.msk.bf16.gmra.mxu2 %vm649_vm2, %v983_v36  ;;  %v635_v36 = vmul.f32 %v2218_v20, %v2164_v54 }
 0x569   :  { %v676_v42 = vpop.f32.mrf.mxu1 }
 0x56a   :  { %v677_v44 = vadd.f32 %v676_v42, %v647_v40 }
 0x56c   :  { %v687_v47 = vsel %vm338_vm1, %v677_v44, -inf }
 0x56d   :  { %688 = vmax.xlane.f32.xlu0 %v687_v47 }
 0x571   :  { %v678_v49 = vpop.f32.mrf.mxu1 }
 0x572   :  { %v2241_v52 = vadd.f32 %v678_v49, %v648_v48 }
 0x574   :  { %v690_v57 = vsel %vm338_vm1, %v2241_v52, -inf }
 0x575   :  { %691 = vmax.xlane.f32.xlu2 %v690_v57  ;;  %1536 = vmatmul.msk.bf16.gmra.mxu2 %vm649_vm2, %v985_v53  ;;  %v970_v57 = vld [vmem:[%s2514_s15 + $0x20] sm:$0xff] }
 0x57e   :  { %737 = vrot.lane.b32.xlu1 %v644_v63, %s1784_s6  ;;  %v972_v63 = vld [vmem:[%s2514_s15 + $0x30] sm:$0xff] }
 0x581   :  { %735 = vrot.lane.b32.xlu0 %v643_v0, %s1784_s6 }
 0x589   :  { %731 = vrot.lane.b32.xlu0 %v641_v3, %s1784_s6  ;;  %v973_v3 = vld [vmem:[%s2514_s15 + $0x38] sm:$0xff] }
 0x5c8   :  { %v1013_v17 = vpop.f32.mrf.mxu2 }
 0x5c9   :  { %v2262_v22 = vadd.f32 %v1013_v17, %v966_v21 }
 0x5cb   :  { %v1033_v55 = vsel %vm176_vm0, %v2262_v22, -inf }
 0x5d0   :  { %v683_v4 = vpop.xlane.xlu2 %682  ;;  %v1015_v45 = vpop.f32.mrf.mxu2 }
 0x5d1   :  { %v693_v5 = vsub.f32 %v672_v29, %v683_v4  ;;  %v2273_v46 = vadd.f32 %v1015_v45, %v967_v26 }
 0x5d3   :  { %v697_v11 = vmul.f32 1.442695, %v693_v5  ;;  %v1036_v41 = vsel %vm176_vm0, %v2273_v46, -inf }
 0x5d5   :  { %1620 = vpow2.f32 %v697_v11 }
 0x5d8   :  { %v686_v12 = vpop.xlane.xlu1 %685  ;;  %v1018_v40 = vpop.f32.mrf.mxu2 }
 0x5d9   :  { %v694_v13 = vsub.f32 %v674_v35, %v686_v12  ;;  %v636_v35 = vmul.f32 %v2222_v51, %v2168_v58 }
 0x5db   :  { %v2255_v14 = vpop.eup %1620  ;;  %v699_v18 = vmul.f32 1.442695, %v694_v13  ;;  %v642_v38 = vpack.c.bf16 %v636_v35, %v635_v36 }
 0x5dc   :  { %v705_v19 = vsel %vm338_vm1, %v2255_v14, 0.0 }
 0x5dd   :  { %1622 = vpow2.f32 %v699_v18  ;;  %706 = vadd.xlane.f32.xlu1 %v705_v19 }
 0x5e0   :  { %v689_v56 = vpop.xlane.xlu0 %688  ;;  %v1020_v42 = vpop.f32.mrf.mxu2 }
 0x5e1   :  { %v695_v23 = vsub.f32 %v677_v44, %v689_v56 }
 0x5e3   :  { %v2264_v24 = vpop.eup %1622  ;;  %v701_v25 = vmul.f32 1.442695, %v695_v23 }
 0x5e4   :  { %v708_v50 = vsel %vm338_vm1, %v2264_v24, 0.0 }
 0x5e5   :  { %1624 = vpow2.f32 %v701_v25  ;;  %709 = vadd.xlane.f32.xlu2 %v708_v50  ;;  %1034 = vmax.xlane.f32.xlu1 %v1033_v55 }
 0x5e8   :  { %v692_v44 = vpop.xlane.xlu2 %691  ;;  %v1023_v48 = vpop.f32.mrf.mxu2 }
 0x5e9   :  { %v696_v51 = vsub.f32 %v2241_v52, %v692_v44  ;;  %v2312_v60 = vadd.f32 %v1023_v48, %v970_v57 }
 0x5eb   :  { %v2275_v29 = vpop.eup %1624  ;;  %v703_v47 = vmul.f32 1.442695, %v696_v51  ;;  %v1045_v0 = vsel %vm176_vm0, %v2312_v60, -inf }
 0x5ec   :  { %v711_v32 = vsel %vm338_vm1, %v2275_v29, 0.0 }
 0x5ed   :  { %712 = vadd.xlane.f32.xlu0 %v711_v32  ;;  %1037 = vmax.xlane.f32.xlu1 %v1036_v41  ;;  %1626 = vpow2.f32 %v703_v47 }
 0x5f0   :  { %v738_v39 = vpop.permute.xlu1 %737  ;;  %v1025_v49 = vpop.f32.mrf.mxu2 }
 0x5f1   :  { %753 = vmatpush.bf16.msrb.mxu0 %v738_v39 }
 0x5f3   :  { %v736_v34 = vpop.permute.xlu0 %735  ;;  %v2293_v20 = vpop.eup %1626 }
 0x5f5   :  { %754 = vmatpush.bf16.msrb.mxu0 %v736_v34 }
 0x5f8   :  { %v1028_v61 = vpop.f32.mrf.mxu2 }
 0x5f9   :  { %v2321_v1 = vadd.f32 %v1028_v61, %v972_v63 }
 0x5fb   :  { %v1051_v2 = vsel %vm176_vm0, %v2321_v1, -inf }
 0x5fd   :  { %733 = vrot.lane.b32.xlu2 %v642_v38, %s1784_s6 }
 0x600   :  { %v1030_v4 = vpop.f32.mrf.mxu2 }
 0x601   :  { %954 = vrot.lane.b32.xlu0 %v2206_v15, %s1782_s25  ;;  %v714_v15 = vsel %vm338_vm1, %v2293_v20, 0.0  ;;  %v2328_v5 = vadd.f32 %v1030_v4, %v973_v3 }
 0x603   :  { %v1054_v11 = vsel %vm176_vm0, %v2328_v5, -inf }
 0x606   :  { %952 = vrot.lane.b32.xlu1 %v2211_v16, %s1782_s25  ;;  %v968_v16 = vld [vmem:[%s2514_s15 + $0x10] sm:$0xff] }
 0x607   :  { %v2303_v53 = vadd.f32 %v1018_v40, %v968_v16 }
 0x609   :  { %948 = vrot.lane.b32.xlu0 %v2186_v7, %s1782_s25  ;;  %v969_v7 = vld [vmem:[%s2514_s15 + $0x18] sm:$0xff]  ;;  %v1039_v59 = vsel %vm176_vm0, %v2303_v53, -inf }
 0x60a   :  { %v2305_v52 = vadd.f32 %v1020_v42, %v969_v7 }
 0x60c   :  { %v1042_v62 = vsel %vm176_vm0, %v2305_v52, -inf }
 0x626   :  { %715 = vadd.xlane.f32.xlu2 %v714_v15 }
 0x62e   :  { %1040 = vmax.xlane.f32.xlu2 %v1039_v59 }
 0x630   :  { %1043 = vmax.xlane.f32.xlu1 %v1042_v62 }
 0x633   :  { %1046 = vmax.xlane.f32.xlu0 %v1045_v0 }
 0x638   :  { %1052 = vmax.xlane.f32.xlu1 %v1051_v2 }
 0x640   :  { %1055 = vmax.xlane.f32.xlu1 %v1054_v11 }
 0x646   :  { %950 = vrot.lane.b32.xlu2 %v2191_v8, %s1782_s25 }
 0x650   :  { %v707_v12 = vpop.xlane.xlu1 %706 }
 0x658   :  { %v1035_v13 = vpop.xlane.xlu1 %1034  ;;  %v710_v17 = vpop.xlane.xlu2 %709 }
 0x659   :  { %v1057_v18 = vsub.f32 %v2262_v22, %v1035_v13  ;;  %1628 = vrcp.f32 %v710_v17  ;;  %v732_v22 = vpop.permute.xlu0 %731 }
 0x65a   :  { %1630 = vrcp.f32 %v707_v12 }
 0x65b   :  { %v1065_v19 = vmul.f32 1.442695, %v1057_v18 }
 0x65d   :  { %1632 = vpow2.f32 %v1065_v19 }
 0x65f   :  { %v1629_v21 = vpop.eup %1628 }
 0x660   :  { %v1038_v56 = vpop.xlane.xlu1 %1037  ;;  %v734_v25 = vpop.permute.xlu2 %733  ;;  %v722_v8 = vmul.f32 %v1629_v21, %v2264_v24 }
 0x661   :  { %v1058_v23 = vsub.f32 %v2273_v46, %v1038_v56  ;;  %v1631_v50 = vpop.eup %1630  ;;  %755 = vmatpush.bf16.msrb.mxu0 %v734_v25  ;;  %v971_v46 = vld [vmem:[%s2514_s15 + $0x28] sm:$0xff]  ;;  %v713_v35 = vpop.xlane.xlu0 %712 }
 0x662   :  { %v721_v32 = vmul.f32 %v1631_v50, %v2255_v14  ;;  %v1026_v39 = vadd.f32 %v1025_v49, %v971_v46 }
 0x663   :  { %v2336_v55 = vpop.eup %1632  ;;  %v1067_v26 = vmul.f32 1.442695, %v1058_v23  ;;  %v1567_v23 = vld [vmem:[#allocation6] sm:$0xff] }
 0x664   :  { %v1081_v45 = vsel %vm176_vm0, %v2336_v55, 0.0  ;;  %v725_v41 = vpack.c.bf16 %v722_v8, %v721_v32  ;;  %v1048_v14 = vsel %vm176_vm0, %v1026_v39, -inf  ;;  %791 = vmatpush.bf16.msrb.mxu3 %v1567_v23 }
 0x665   :  { %1634 = vpow2.f32 %v1067_v26  ;;  %1082 = vadd.xlane.f32.xlu0 %v1081_v45  ;;  %756 = vmatpush.bf16.msrb.mxu0 %v732_v22 }
 0x666   :  { %1636 = vrcp.f32 %v713_v35 }
 0x668   :  { %1515 = vmatmul.msk.bf16.vlgmr.msrb.gmra.mxu0 %vm338_vm1, %v725_v41 }
 0x66b   :  { %v2346_v34 = vpop.eup %1634 }
 0x66c   :  { %v1084_v24 = vsel %vm176_vm0, %v2346_v34, 0.0  ;;  %v1637_v47 = vpop.eup %1636 }
 0x66d   :  { %1085 = vadd.xlane.f32.xlu1 %v1084_v24  ;;  %v723_v16 = vmul.f32 %v1637_v47, %v2275_v29 }
 0x66f   :  { %1049 = vmax.xlane.f32.xlu2 %v1048_v14 }
 0x673   :  { %v955_v36 = vpop.permute.xlu0 %954 }
 0x674   :  { %v963_v40 = vmul.f32 %v955_v36, %v2193_v9 }
 0x678   :  { %v953_v38 = vpop.permute.xlu1 %952 }
 0x679   :  { %v962_v42 = vmul.f32 %v953_v38, %v2181_v6 }
 0x67b   :  { %v965_v44 = vpack.c.bf16 %v963_v40, %v962_v42  ;;  %v949_v48 = vpop.permute.xlu0 %948 }
 0x67c   :  { %v960_v29 = vmul.f32 %v949_v48, %v2181_v6 }
 0x67d   :  { %1129 = vrot.lane.b32.xlu0 %v965_v44, %s1781_s26 }
 0x699   :  { %v716_v51 = vpop.xlane.xlu2 %715 }
 0x69a   :  { %1638 = vrcp.f32 %v716_v51 }
 0x6a0   :  { %v1639_v49 = vpop.eup %1638 }
 0x6a1   :  { %v1041_v15 = vpop.xlane.xlu2 %1040  ;;  %v724_v7 = vmul.f32 %v1639_v49, %v2293_v20 }
 0x6a2   :  { %v1059_v57 = vsub.f32 %v2303_v53, %v1041_v15 }
 0x6a3   :  { %v1044_v59 = vpop.xlane.xlu1 %1043  ;;  %v726_v61 = vpack.c.bf16 %v724_v7, %v723_v16 }
 0x6a4   :  { %v1069_v62 = vmul.f32 1.442695, %v1059_v57  ;;  %v1060_v63 = vsub.f32 %v2305_v52, %v1044_v59 }
 0x6a5   :  { %1516 = vmatmul.msk.bf16.gmra.mxu0 %vm338_vm1, %v726_v61 }
 0x6a6   :  { %1640 = vpow2.f32 %v1069_v62  ;;  %v1047_v0 = vpop.xlane.xlu0 %1046  ;;  %v1071_v3 = vmul.f32 1.442695, %v1060_v63 }
 0x6a7   :  { %v1061_v2 = vsub.f32 %v2312_v60, %v1047_v0 }
 0x6a9   :  { %v1073_v4 = vmul.f32 1.442695, %v1061_v2  ;;  %v951_v11 = vpop.permute.xlu2 %950 }
 0x6aa   :  { %v961_v20 = vmul.f32 %v951_v11, %v2193_v9 }
 0x6ab   :  { %1642 = vpow2.f32 %v1073_v4  ;;  %v1053_v19 = vpop.xlane.xlu1 %1052 }
 0x6ac   :  { %v2362_v53 = vpop.eup %1640  ;;  %1644 = vpow2.f32 %v1071_v3  ;;  %v964_v12 = vpack.c.bf16 %v961_v20, %v960_v29  ;;  %v1063_v21 = vsub.f32 %v2321_v1, %v1053_v19 }
 0x6ad   :  { %v1087_v52 = vsel %vm176_vm0, %v2362_v53, 0.0 }
 0x6ae   :  { %1088 = vadd.xlane.f32.xlu2 %v1087_v52  ;;  %1127 = vrot.lane.b32.xlu1 %v964_v12, %s1781_s26  ;;  %v1077_v56 = vmul.f32 1.442695, %v1063_v21 }
 0x6b0   :  { %1646 = vpow2.f32 %v1077_v56 }
 0x6b1   :  { %v2367_v13 = vpop.eup %1642 }
 0x6b2   :  { %v1645_v60 = vpop.eup %1644  ;;  %v1093_v17 = vsel %vm176_vm0, %v2367_v13, 0.0 }
 0x6b3   :  { %1094 = vadd.xlane.f32.xlu0 %v1093_v17  ;;  %v1090_v18 = vsel %vm176_vm0, %v1645_v60, 0.0  ;;  %v1056_v8 = vpop.xlane.xlu1 %1055 }
 0x6b4   :  { %v1064_v22 = vsub.f32 %v2328_v5, %v1056_v8 }
 0x6b6   :  { %1091 = vadd.xlane.f32.xlu2 %v1090_v18  ;;  %v2373_v25 = vpop.eup %1646  ;;  %v1079_v41 = vmul.f32 1.442695, %v1064_v22 }
 0x6b7   :  { %v1099_v50 = vsel %vm176_vm0, %v2373_v25, 0.0 }
 0x6d8   :  { %1100 = vadd.xlane.f32.xlu1 %v1099_v50  ;;  %v1083_v46 = vpop.xlane.xlu0 %1082 }
 0x6e0   :  { %v1086_v40 = vpop.xlane.xlu1 %1085 }
 0x6e2   :  { %v1050_v26 = vpop.xlane.xlu2 %1049 }
 0x6e3   :  { %v1062_v45 = vsub.f32 %v1026_v39, %v1050_v26  ;;  %v1563_v26 = vld [vmem:[%s2506_s7 + $0x10] sm:$0xff] }
 0x6e5   :  { %v1075_v32 = vmul.f32 1.442695, %v1062_v45  ;;  %v758_v38 = vpop.f32.mrf.mxu0 }
 0x6e6   :  { %v768_v47 = vsel %vm649_vm2, %v758_v38, 0.0 }
 0x6e7   :  { %1648 = vpow2.f32 %v1075_v32 }
 0x6e8   :  { %1650 = vpow2.f32 %v1079_v41 }
 0x6e9   :  { %1652 = vrcp.f32 %v1086_v40 }
 0x6ea   :  { %1654 = vrcp.f32 %v1083_v46  ;;  %v1568_v46 = vld [vmem:[#allocation6 + $0x8] sm:$0xff] }
 0x6eb   :  { %1207 = vmatpush.bf16.msra.mxu0 %v1568_v46 }
 0x6ed   :  { %v1649_v1 = vpop.eup %1648  ;;  %v760_v39 = vpop.f32.mrf.mxu0 }
 0x6ee   :  { %v1096_v24 = vsel %vm176_vm0, %v1649_v1, 0.0  ;;  %v1651_v14 = vpop.eup %1650  ;;  %v771_v48 = vsel %vm649_vm2, %v760_v39, 0.0 }
 0x6ef   :  { %v1130_v35 = vpop.permute.xlu0 %1129  ;;  %1097 = vadd.xlane.f32.xlu2 %v1096_v24  ;;  %v1102_v36 = vsel %vm176_vm0, %v1651_v14, 0.0  ;;  %v1653_v59 = vpop.eup %1652 }
 0x6f0   :  { %1151 = vmatpush.bf16.msra.mxu3 %v1130_v35  ;;  %v1655_v61 = vpop.eup %1654  ;;  %v1114_v62 = vmul.f32 %v1653_v59, %v2346_v34 }
 0x6f1   :  { %v1113_v63 = vmul.f32 %v1655_v61, %v2336_v55 }
 0x6f3   :  { %v1121_v0 = vpack.c.bf16 %v1114_v62, %v1113_v63  ;;  %v1566_v62 = vld [vmem:[%s2506_s7 + $0x28] sm:$0xff] }
 0x6f7   :  { %1103 = vadd.xlane.f32.xlu2 %v1102_v36 }
 0x720   :  { %v1128_v42 = vpop.permute.xlu1 %1127 }
 0x721   :  { %1152 = vmatpush.bf16.msra.mxu3 %v1128_v42  ;;  %v1089_v57 = vpop.xlane.xlu2 %1088 }
 0x722   :  { %v763_v5 = vpop.f32.mrf.mxu0 }
 0x723   :  { %v769_v44 = vsel %vm649_vm2, %v763_v5, 0.0 }
 0x724   :  { %v770_v15 = vadd.f32 %v769_v44, %v768_v47 }
 0x726   :  { %v1095_v12 = vpop.xlane.xlu0 %1094 }
 0x729   :  { %v1092_v2 = vpop.xlane.xlu2 %1091 }
 0x72a   :  { %v765_v51 = vpop.f32.mrf.mxu0  ;;  %1656 = vrcp.f32 %v1092_v2 }
 0x72b   :  { %v772_v49 = vsel %vm649_vm2, %v765_v51, 0.0  ;;  %1658 = vrcp.f32 %v1089_v57 }
 0x72c   :  { %v773_v16 = vadd.f32 %v772_v49, %v771_v48  ;;  %1660 = vrcp.f32 %v1095_v12 }
 0x72e   :  { %v774_v7 = vpack.c.bf16 %v773_v16, %v770_v15 }
 0x730   :  { %1521 = vmatmul.msk.bf16.vlgmr.msrb.gmra.mxu3 %vm649_vm2, %v774_v7  ;;  %v1657_v3 = vpop.eup %1656 }
 0x731   :  { %v1659_v4 = vpop.eup %1658  ;;  %v1116_v11 = vmul.f32 %v1657_v3, %v1645_v60  ;;  %v1565_v3 = vld [vmem:[%s2506_s7 + $0x20] sm:$0xff] }
 0x732   :  { %v1115_v29 = vmul.f32 %v1659_v4, %v2362_v53  ;;  %v1661_v34 = vpop.eup %1660 }
 0x733   :  { %v1117_v17 = vmul.f32 %v1661_v34, %v2367_v13  ;;  %v1564_v13 = vld [vmem:[%s2506_s7 + $0x18] sm:$0xff]  ;;  %s1786_s7 = smov 80  }
 0x734   :  { %v1122_v20 = vpack.c.bf16 %v1116_v11, %v1115_v29  ;;  %820 = vmatpush.bf16.msrb.mxu1 %v1564_v13 }
 0x738   :  { %821 = vmatpush.bf16.msrb.mxu1 %v1563_v26 }
 0x73c   :  { %1245 = vmatpush.bf16.msra.mxu1 %v1566_v62 }
 0x740   :  { %1537 = vmatmul.msk.bf16.vlgmr.msra.gmra.mxu3 %vm176_vm0, %v1121_v0  ;;  %v111_v0 = vld [vmem:[%s2508_s9] sm:$0x3]  ;;  %1246 = vmatpush.bf16.msra.mxu1 %v1565_v3 }
 0x741   :  { %v838_v2 = vperm.slane %v111_v0, 0 }
 0x74b   :  { %v1101_v56 = vpop.xlane.xlu1 %1100 }
 0x750   :  { %1538 = vmatmul.msk.bf16.gmra.mxu3 %vm176_vm0, %v1122_v20 }
 0x762   :  { %v1098_v52 = vpop.xlane.xlu2 %1097 }
 0x763   :  { %1662 = vrcp.f32 %v1098_v52 }
 0x769   :  { %v1663_v55 = vpop.eup %1662 }
 0x76a   :  { %v1118_v18 = vmul.f32 %v1663_v55, %v1649_v1  ;;  %v1104_v19 = vpop.xlane.xlu2 %1103 }
 0x76b   :  { %1664 = vrcp.f32 %v1104_v19 }
 0x76c   :  { %v1123_v21 = vpack.c.bf16 %v1118_v18, %v1117_v17  ;;  %1666 = vrcp.f32 %v1101_v56 }
 0x76e   :  { %1539 = vmatmul.msk.bf16.gmra.mxu3 %vm176_vm0, %v1123_v21 }
 0x771   :  { %v1665_v53 = vpop.eup %1664 }
 0x772   :  { %v1667_v60 = vpop.eup %1666  ;;  %v1120_v23 = vmul.f32 %v1665_v53, %v1651_v14 }
 0x773   :  { %v1119_v50 = vmul.f32 %v1667_v60, %v2373_v25 }
 0x775   :  { %v1124_v8 = vpack.c.bf16 %v1120_v23, %v1119_v50 }
 0x77e   :  { %1540 = vmatmul.msk.bf16.gmra.mxu3 %vm176_vm0, %v1124_v8 }
 0x7b3   :  { %v793_v45 = vpop.f32.mrf.mxu3 }
 0x7bb   :  { %v2400_v22 = vpop.f32.mrf.mxu3 }
 0x7bc   :  { %v798_v32 = vpack.c.bf16 %v2400_v22, %v793_v45 }
 0x7be   :  { %1530 = vmatmul.msk.bf16.vlgmr.msrb.gmra.mxu1 %vm176_vm0, %v798_v32 }
 0x7c3   :  { %v1154_v25 = vpop.f32.mrf.mxu3 }
 0x7c4   :  { %v1174_v38 = vsel %vm649_vm2, %v1154_v25, 0.0  ;;  %v1278_v25 = vperm.slane %v111_v0, 1 }
 0x7cb   :  { %v1156_v41 = vpop.f32.mrf.mxu3 }
 0x7cc   :  { %v1177_v40 = vsel %vm649_vm2, %v1156_v41, 0.0 }
 0x7d3   :  { %v1159_v1 = vpop.f32.mrf.mxu3 }
 0x7d4   :  { %v1180_v49 = vsel %vm649_vm2, %v1159_v1, 0.0 }
 0x7db   :  { %v1161_v24 = vpop.f32.mrf.mxu3 }
 0x7dc   :  { %v1183_v15 = vsel %vm649_vm2, %v1161_v24, 0.0 }
 0x7f1   :  { %v1164_v35 = vpop.f32.mrf.mxu3 }
 0x7f2   :  { %v1175_v14 = vsel %vm649_vm2, %v1164_v35, 0.0 }
 0x7f3   :  { %v1176_v42 = vadd.f32 %v1175_v14, %v1174_v38 }
 0x7f9   :  { %v1166_v36 = vpop.f32.mrf.mxu3 }
 0x7fa   :  { %v1178_v39 = vsel %vm649_vm2, %v1166_v36, 0.0 }
 0x7fb   :  { %v1179_v5 = vadd.f32 %v1178_v39, %v1177_v40 }
 0x7fd   :  { %v1186_v44 = vpack.c.bf16 %v1179_v5, %v1176_v42 }
 0x7ff   :  { %1545 = vmatmul.msk.bf16.vlgmr.msra.gmra.mxu0 %vm649_vm2, %v1186_v44 }
 0x801   :  { %v1169_v51 = vpop.f32.mrf.mxu3 }
 0x802   :  { %v1181_v47 = vsel %vm649_vm2, %v1169_v51, 0.0 }
 0x803   :  { %v1182_v7 = vadd.f32 %v1181_v47, %v1180_v49 }
 0x809   :  { %v1171_v48 = vpop.f32.mrf.mxu3 }
 0x80a   :  { %v1184_v16 = vsel %vm649_vm2, %v1171_v48, 0.0 }
 0x80b   :  { %v1185_v57 = vadd.f32 %v1184_v16, %v1183_v15 }
 0x80d   :  { %v1187_v59 = vpack.c.bf16 %v1185_v57, %v1182_v7 }
 0x80f   :  { %1546 = vmatmul.msk.bf16.gmra.mxu0 %vm649_vm2, %v1187_v59 }
 0x83b   :  { %v823_v61 = vpop.f32.mrf.mxu1 }
 0x83c   :  { %830 = vrot.lane.b32.xlu2 %v823_v61, %s1785_s11 }
 0x843   :  { %v825_v63 = vpop.f32.mrf.mxu1 }
 0x844   :  { %832 = vrot.lane.b32.xlu0 %v825_v63, %s1785_s11 }
 0x84c   :  { %840 = vrot.lane.b32.xlu0 %v838_v2, %s1785_s11 }
 0x854   :  { %885 = vrot.lane.b32.xlu0 %v2148_v10, %s1785_s11 }
 0x85c   :  { %897 = vrot.lane.b32.xlu0 %v793_v45, %s1785_s11 }
 0x864   :  { %1373 = vrot.lane.b32.xlu0 %v2124_v28, %s1785_s11 }
 0x87c   :  { %v1209_v4 = vpop.f32.mrf.mxu0 }
 0x87d   :  { %1668 = vtanh.f32 %v1209_v4 }
 0x883   :  { %v1669_v11 = vpop.eup %1668 }
 0x884   :  { %1395 = vrot.lane.b32.xlu0 %v1669_v11, %s1785_s11  ;;  %v1211_v29 = vpop.f32.mrf.mxu0 }
 0x885   :  { %v1219_v20 = vpack.c.bf16 %v1211_v29, %v1209_v4 }
 0x887   :  { %1555 = vmatmul.msk.bf16.vlgmr.msra.gmra.mxu1 %vm176_vm0, %v1219_v20 }
 0x88c   :  { %v1214_v10 = vpop.f32.mrf.mxu0 }
 0x894   :  { %v1216_v12 = vpop.f32.mrf.mxu0 }
 0x895   :  { %v1220_v52 = vpack.c.bf16 %v1216_v12, %v1214_v10  ;;  %1670 = vtanh.f32 %v1216_v12 }
 0x896   :  { %v831_v19 = vpop.permute.xlu2 %830 }
 0x897   :  { %1556 = vmatmul.msk.bf16.gmra.mxu1 %vm176_vm0, %v1220_v52  ;;  %v836_v21 = vadd.f32 %v831_v19, %v2181_v6 }
 0x89b   :  { %v1671_v34 = vpop.eup %1670 }
 0x89c   :  { %1401 = vrot.lane.b32.xlu0 %v1671_v34, %s1785_s11 }
 0x8b6   :  { %v833_v55 = vpop.permute.xlu0 %832 }
 0x8b7   :  { %v837_v28 = vadd.f32 %v833_v55, %v2193_v9 }
 0x8be   :  { %v841_v17 = vpop.permute.xlu0 %840 }
 0x8bf   :  { %v844_v18 = vadd.f32 %v841_v17, %v837_v28  ;;  %v843_v56 = vadd.f32 %v841_v17, %v836_v21 }
 0x8c1   :  { %v1531_v53 = vmul.f32 -1.442695, %v843_v56  ;;  %v1532_v44 = vmul.f32 -1.442695, %v844_v18 }
 0x8c3   :  { %1672 = vpow2.f32 %v1531_v53 }
 0x8c6   :  { %v886_v24 = vpop.permute.xlu0 %885 }
 0x8c9   :  { %v1673_v23 = vpop.eup %1672 }
 0x8ca   :  { %v851_v50 = vadd.f32 1.0, %v1673_v23 }
 0x8cc   :  { %1674 = vrcp.f32 %v851_v50  ;;  %v864_v41 = vand.u32 2147483648, %v851_v50  ;;  %vm858_vm4 = vweird.f32 %v851_v50  ;;  %v862_v1 = vand.u32 2147483647, %v851_v50 }
 0x8cd   :  { %1676 = vtanh.f32 %v1211_v29 }
 0x8ce   :  { %v865_v14 = vor.u32 1.1754944e-38, %v864_v41  ;;  %vm863_vm6 = vcmp.eq.f32.partialorder %v862_v1, 8.507059e+37  ;;  %v898_v40 = vpop.permute.xlu0 %897  ;;  %1678 = vtanh.f32 %v1214_v10 }
 0x8cf   :  { %1680 = vpow2.f32 %v1532_v44 }
 0x8d2   :  { %v1675_v13 = vpop.eup %1674 }
 0x8d3   :  { %v854_v9 = vmul.f32 %v1675_v13, %v851_v50  ;;  %vm859_vm3 = vweird.f32 %v1675_v13  ;;  %v1677_v38 = vpop.eup %1676 }
 0x8d4   :  { %vm860_vm5 = vmor %vm858_vm4, %vm859_vm3 }
 0x8d5   :  { %v855_v45 = vsub.f32 1.0, %v854_v9 }
 0x8d7   :  { %v856_v6 = vmul.f32 %v1675_v13, %v855_v45  ;;  %v1374_v45 = vpop.permute.xlu0 %1373 }
 0x8d9   :  { %v857_v46 = vadd.f32 %v1675_v13, %v856_v6 }
 0x8db   :  { %v861_v35 = vsel %vm860_vm5, %v1675_v13, %v857_v46 }
 0x904   :  { %v1248_v60 = vpop.f32.mrf.mxu1 }
 0x905   :  { %1262 = vrot.lane.b32.xlu2 %v1248_v60, %s1785_s11 }
 0x90c   :  { %v1250_v8 = vpop.f32.mrf.mxu1 }
 0x90d   :  { %1264 = vrot.lane.b32.xlu2 %v1250_v8, %s1785_s11 }
 0x914   :  { %v1253_v26 = vpop.f32.mrf.mxu1 }
 0x915   :  { %1266 = vrot.lane.b32.xlu1 %v1253_v26, %s1785_s11 }
 0x91c   :  { %v1255_v32 = vpop.f32.mrf.mxu1 }
 0x91d   :  { %899 = vrot.lane.b32.xlu1 %v2400_v22, %s1785_s11  ;;  %1268 = vrot.lane.b32.xlu2 %v1255_v32, %s1785_s11  ;;  %v866_v22 = vsel %vm863_vm6, %v865_v14, %v861_v35 }
 0x91e   :  { %v893_v36 = vsub.f32 1.0, %v866_v22  ;;  %v891_v42 = vmul.f32 %v886_v24, %v866_v22 }
 0x920   :  { %v903_v39 = vmul.f32 %v898_v40, %v893_v36 }
 0x922   :  { %v905_v5 = vadd.f32 %v903_v39, %v891_v42 }
 0x925   :  { %1375 = vrot.lane.b32.xlu1 %v2138_v30, %s1785_s11  ;;  %1280 = vrot.lane.b32.xlu2 %v1278_v25, %s1785_s11  ;;  %v1679_v30 = vpop.eup %1678 }
 0x926   :  { %v1681_v51 = vpop.eup %1680 }
 0x927   :  { %v852_v47 = vadd.f32 1.0, %v1681_v51 }
 0x929   :  { %1682 = vrcp.f32 %v852_v47  ;;  %v879_v29 = vand.u32 2147483648, %v852_v47  ;;  %vm873_vm8 = vweird.f32 %v852_v47 }
 0x92b   :  { %v880_v10 = vor.u32 1.1754944e-38, %v879_v29 }
 0x92d   :  { %1397 = vrot.lane.b32.xlu1 %v1677_v38, %s1785_s11  ;;  %887 = vrot.lane.b32.xlu2 %v2150_v33, %s1785_s11 }
 0x92f   :  { %v1683_v49 = vpop.eup %1682 }
 0x930   :  { %vm874_vm7 = vweird.f32 %v1683_v49 }
 0x931   :  { %vm875_vm9 = vmor %vm873_vm8, %vm874_vm7 }
 0x935   :  { %1371 = vrot.lane.b32.xlu2 %v2119_v27, %s1785_s11  ;;  %1421 = vrot.lane.b32.xlu1 %v905_v5, %s1786_s7  ;;  %v869_v27 = vmul.f32 %v1683_v49, %v852_v47 }
 0x937   :  { %v870_v16 = vsub.f32 1.0, %v869_v27 }
 0x939   :  { %v871_v0 = vmul.f32 %v1683_v49, %v870_v16 }
 0x93b   :  { %v872_v11 = vadd.f32 %v1683_v49, %v871_v0 }
 0x93d   :  { %1377 = vrot.lane.b32.xlu2 %v2143_v31, %s1785_s11 }
 0x945   :  { %1399 = vrot.lane.b32.xlu2 %v1679_v30, %s1785_s11 }
 0x95f   :  { %v1263_v33 = vpop.permute.xlu2 %1262 }
 0x960   :  { %v1274_v7 = vadd.f32 %v1263_v33, %v2155_v37  ;;  %v877_v37 = vand.u32 2147483647, %v852_v47 }
 0x962   :  { %vm878_vm10 = vcmp.eq.f32.partialorder %v877_v37, 8.507059e+37 }
 0x967   :  { %v1265_v48 = vpop.permute.xlu2 %1264 }
 0x968   :  { %v1275_v57 = vadd.f32 %v1265_v48, %v2158_v43 }
 0x977   :  { %v1269_v15 = vpop.permute.xlu2 %1268 }
 0x978   :  { %v1277_v31 = vadd.f32 %v1269_v15, %v2168_v58  ;;  %v876_v58 = vsel %vm875_vm9, %v1683_v49, %v872_v11 }
 0x979   :  { %v881_v28 = vsel %vm878_vm10, %v880_v10, %v876_v58 }
 0x97a   :  { %v894_v53 = vsub.f32 1.0, %v881_v28 }
 0x97f   :  { %v1281_v59 = vpop.permute.xlu2 %1280 }
 0x980   :  { %v1283_v61 = vadd.f32 %v1281_v59, %v1274_v7  ;;  %v1284_v62 = vadd.f32 %v1281_v59, %v1275_v57  ;;  %v1286_v63 = vadd.f32 %v1281_v59, %v1277_v31 }
 0x982   :  { %v1557_v2 = vmul.f32 -1.442695, %v1283_v61  ;;  %v1558_v3 = vmul.f32 -1.442695, %v1284_v62  ;;  %v1560_v4 = vmul.f32 -1.442695, %v1286_v63  ;;  %v1396_v61 = vpop.permute.xlu0 %1395 }
 0x984   :  { %1684 = vpow2.f32 %v1557_v2 }
 0x985   :  { %1686 = vpow2.f32 %v1558_v3 }
 0x986   :  { %1688 = vpow2.f32 %v1560_v4 }
 0x987   :  { %v1267_v20 = vpop.permute.xlu1 %1266  ;;  %v888_v56 = vpop.permute.xlu2 %887 }
 0x988   :  { %v1276_v43 = vadd.f32 %v1267_v20, %v2164_v54  ;;  %v892_v54 = vmul.f32 %v888_v56, %v881_v28 }
 0x98a   :  { %v1685_v12 = vpop.eup %1684  ;;  %v1285_v52 = vadd.f32 %v1281_v59, %v1276_v43 }
 0x98b   :  { %v1687_v34 = vpop.eup %1686  ;;  %v1299_v55 = vadd.f32 1.0, %v1685_v12 }
 0x98c   :  { %v1689_v17 = vpop.eup %1688  ;;  %v1300_v18 = vadd.f32 1.0, %v1687_v34  ;;  %v1559_v19 = vmul.f32 -1.442695, %v1285_v52 }
 0x98d   :  { %v1302_v21 = vadd.f32 1.0, %v1689_v17  ;;  %1690 = vrcp.f32 %v1299_v55  ;;  %vm1308_vm11 = vweird.f32 %v1299_v55  ;;  %v1312_v25 = vand.u32 2147483647, %v1299_v55 }
 0x98e   :  { %1692 = vrcp.f32 %v1300_v18  ;;  %v1314_v24 = vand.u32 2147483648, %v1299_v55  ;;  %v1327_v36 = vand.u32 2147483647, %v1300_v18  ;;  %v1329_v5 = vand.u32 2147483648, %v1300_v18 }
 0x98f   :  { %1694 = vrcp.f32 %v1302_v21  ;;  %v900_v60 = vpop.permute.xlu1 %899  ;;  %v1372_v35 = vpop.permute.xlu2 %1371  ;;  %v1357_v39 = vand.u32 2147483647, %v1302_v21  ;;  %v1359_v42 = vand.u32 2147483648, %v1302_v21  ;;  %vm1313_vm1 = vcmp.eq.f32.partialorder %v1312_v25, 8.507059e+37 }
 0x990   :  { %1696 = vpow2.f32 %v1559_v19  ;;  %v904_v23 = vmul.f32 %v900_v60, %v894_v53  ;;  %v1315_v51 = vor.u32 1.1754944e-38, %v1314_v24  ;;  %vm1323_vm2 = vweird.f32 %v1300_v18 }
 0x991   :  { %vm1353_vm3 = vweird.f32 %v1302_v21  ;;  %vm1358_vm6 = vcmp.eq.f32.partialorder %v1357_v39, 8.507059e+37  ;;  %v1360_v27 = vor.u32 1.1754944e-38, %v1359_v42  ;;  %v1330_v16 = vor.u32 1.1754944e-38, %v1329_v5 }
 0x992   :  { %v906_v50 = vadd.f32 %v904_v23, %v892_v54  ;;  %vm1328_vm7 = vcmp.eq.f32.partialorder %v1327_v36, 8.507059e+37 }
 0x993   :  { %v1691_v8 = vpop.eup %1690 }
 0x994   :  { %v1693_v13 = vpop.eup %1692  ;;  %v1304_v26 = vmul.f32 %v1691_v8, %v1299_v55  ;;  %1423 = vrot.lane.b32.xlu2 %v906_v50, %s1786_s7  ;;  %vm1309_vm12 = vweird.f32 %v1691_v8 }
 0x995   :  { %v1695_v9 = vpop.eup %1694  ;;  %v1319_v32 = vmul.f32 %v1693_v13, %v1300_v18  ;;  %vm1324_vm13 = vweird.f32 %v1693_v13  ;;  %vm1310_vm15 = vmor %vm1308_vm11, %vm1309_vm12  ;;  %v1402_v18 = vpop.permute.xlu0 %1401 }
 0x996   :  { %v1697_v6 = vpop.eup %1696  ;;  %v1305_v46 = vsub.f32 1.0, %v1304_v26  ;;  %v1349_v41 = vmul.f32 %v1695_v9, %v1302_v21  ;;  %vm1354_vm14 = vweird.f32 %v1695_v9  ;;  %vm1325_vm4 = vmor %vm1323_vm2, %vm1324_vm13 }
 0x997   :  { %v2460_v1 = vadd.f32 1.0, %v1697_v6  ;;  %v2462_v14 = vpop.permute.xlu1 %1375  ;;  %v1320_v22 = vsub.f32 1.0, %v1319_v32  ;;  %vm1355_vm5 = vmor %vm1353_vm3, %vm1354_vm14  ;;  %v1378_v11 = vpop.permute.xlu2 %1377 }
 0x998   :  { %v1306_v38 = vmul.f32 %v1691_v8, %v1305_v46  ;;  %v1350_v40 = vsub.f32 1.0, %v1349_v41 }
 0x999   :  { %1698 = vrcp.f32 %v2460_v1  ;;  %v1321_v33 = vmul.f32 %v1693_v13, %v1320_v22  ;;  %v1344_v10 = vand.u32 2147483648, %v2460_v1  ;;  %v1342_v34 = vand.u32 2147483647, %v2460_v1 }
 0x99a   :  { %v1307_v30 = vadd.f32 %v1691_v8, %v1306_v38  ;;  %v1351_v44 = vmul.f32 %v1695_v9, %v1350_v40  ;;  %vm1338_vm9 = vweird.f32 %v2460_v1 }
 0x99b   :  { %v1322_v49 = vadd.f32 %v1693_v13, %v1321_v33  ;;  %v1345_v19 = vor.u32 1.1754944e-38, %v1344_v10  ;;  %vm1343_vm11 = vcmp.eq.f32.partialorder %v1342_v34, 8.507059e+37 }
 0x99c   :  { %v1311_v47 = vsel %vm1310_vm15, %v1691_v8, %v1307_v30  ;;  %v1352_v48 = vadd.f32 %v1695_v9, %v1351_v44 }
 0x99d   :  { %v1316_v15 = vsel %vm1313_vm1, %v1315_v51, %v1311_v47  ;;  %v1326_v31 = vsel %vm1325_vm4, %v1693_v13, %v1322_v49 }
 0x99e   :  { %v1363_v7 = vsub.f32 1.0, %v1316_v15  ;;  %v1356_v57 = vsel %vm1355_vm5, %v1695_v9, %v1352_v48  ;;  %v1331_v0 = vsel %vm1328_vm7, %v1330_v16, %v1326_v31  ;;  %v1407_v2 = vmul.f32 %v1396_v61, %v1316_v15 }
 0x99f   :  { %v1699_v59 = vpop.eup %1698  ;;  %v1361_v62 = vsel %vm1358_vm6, %v1360_v27, %v1356_v57  ;;  %v1398_v63 = vpop.permute.xlu1 %1397  ;;  %v1364_v29 = vsub.f32 1.0, %v1331_v0 }
 0x9a0   :  { %v1383_v3 = vmul.f32 %v1372_v35, %v1363_v7  ;;  %v1334_v4 = vmul.f32 %v1699_v59, %v2460_v1  ;;  %v1408_v37 = vmul.f32 %v1398_v63, %v1331_v0  ;;  %v1366_v58 = vsub.f32 1.0, %v1361_v62  ;;  %v1400_v50 = vpop.permute.xlu2 %1399 }
 0x9a1   :  { %v1384_v12 = vmul.f32 %v1374_v45, %v1364_v29  ;;  %vm1339_vm8 = vweird.f32 %v1699_v59  ;;  %v1410_v53 = vmul.f32 %v1402_v18, %v1361_v62 }
 0x9a2   :  { %v1411_v20 = vadd.f32 %v1407_v2, %v1383_v3  ;;  %v1335_v43 = vsub.f32 1.0, %v1334_v4  ;;  %v1386_v17 = vmul.f32 %v1378_v11, %v1366_v58  ;;  %vm1340_vm10 = vmor %vm1338_vm9, %vm1339_vm8 }
 0x9a3   :  { %v1412_v55 = vadd.f32 %v1408_v37, %v1384_v12 }
 0x9a4   :  { %v1336_v52 = vmul.f32 %v1699_v59, %v1335_v43  ;;  %1425 = vrot.lane.b32.xlu0 %v1411_v20, %s1786_s7  ;;  %v1414_v23 = vadd.f32 %v1410_v53, %v1386_v17 }
 0x9a5   :  { %1427 = vrot.lane.b32.xlu1 %v1412_v55, %s1786_s7 }
 0x9a6   :  { %v1337_v28 = vadd.f32 %v1699_v59, %v1336_v52 }
 0x9a7   :  { %v1422_v21 = vpop.permute.xlu1 %1421 }
 0x9a8   :  { %v1341_v56 = vsel %vm1340_vm10, %v1699_v59, %v1337_v28  ;;  %1439 = vst.msk [vmem:[%s2515_s16] sm:$0xff] %vm176_vm0, %v1422_v21 }
 0x9a9   :  { %v1346_v60 = vsel %vm1343_vm11, %v1345_v19, %v1341_v56 }
 0x9aa   :  { %v1365_v54 = vsub.f32 1.0, %v1346_v60  ;;  %v1409_v13 = vmul.f32 %v1400_v50, %v1346_v60 }
 0x9ac   :  { %v1385_v8 = vmul.f32 %v2462_v14, %v1365_v54  ;;  %1431 = vrot.lane.b32.xlu0 %v1414_v23, %s1786_s7 }
 0x9ae   :  { %v1413_v26 = vadd.f32 %v1409_v13, %v1385_v8 }
 0x9b0   :  { %1429 = vrot.lane.b32.xlu2 %v1413_v26, %s1786_s7 }
 0x9ee   :  { %v1424_v9 = vpop.permute.xlu2 %1423 }
 0x9ef   :  { %1440 = vst.msk [vmem:[%s2515_s16 + $0x8] sm:$0xff] %vm176_vm0, %v1424_v9 }
 0xa0a   :  { %v1430_v45 = vpop.permute.xlu2 %1429 }
 0xa0b   :  { %1443 = vst.msk [vmem:[%s2515_s16 + $0x20] sm:$0xff] %vm176_vm0, %v1430_v45 }
 0xa16   :  { %v1426_v32 = vpop.permute.xlu0 %1425 }
 0xa17   :  { %1441 = vst.msk [vmem:[%s2515_s16 + $0x10] sm:$0xff] %vm176_vm0, %v1426_v32  ;;  %v1428_v6 = vpop.permute.xlu1 %1427 }
 0xa18   :  { %1442 = vst.msk [vmem:[%s2515_s16 + $0x18] sm:$0xff] %vm176_vm0, %v1428_v6 }
 0xa1e   :  { %v1432_v46 = vpop.permute.xlu0 %1431 }
 0xa1f   :  { %1444 = vst.msk [vmem:[%s2515_s16 + $0x28] sm:$0xff] %vm176_vm0, %v1432_v46 }
 0xa20   :  { %1449 = vsyncpa [#allocation3], 1 }
 0xa21   :  { %1450 = vsyncpa [#allocation5], 1 }

</bundles_post_ra>
